<compile_context>
chip_gen: v6e
topology: v6e:2x2x1
jax: 0.10.0
libtpu: 0.0.40
codegen_flags: <defaults>
</compile_context>

<pallas_src>
import functools

import jax
import jax.numpy as jnp
from jax import lax
from jax.experimental import pallas as pl
from jax.experimental.pallas import tpu as pltpu

KPAD = 128      # lane-dense padding of the RGB output channels
FC1_OUT = 128   # module hardcodes fc_1 -> 128


def fused_kernel(x1_ref, x2_ref, w1_ref, w2_ref, wdec_ref, gw_ref, gb_ref,
                 wrgb_ref, o_ref):
    f32 = jnp.float32
    bf16 = jnp.bfloat16

    # fc_1 + tanh (bf16 MXU operands, f32 accumulation).
    a1 = jnp.tanh(jnp.dot(x1_ref[...].astype(bf16), w1_ref[...],
                          preferred_element_type=f32))

    # fc_2 over concat([tanh(fc_1(x1)), x2]) as a single K=(128+samp)
    # contraction (fills the 256-wide MXU on v6e/v7x in one push).
    zin = jnp.concatenate([a1, x2_ref[...]], axis=1).astype(bf16)
    z = jnp.tanh(jnp.dot(zin, w2_ref[...], preferred_element_type=f32))

    # block1 ConvTranspose2d(k=4, s=1, p=0) applied to a 1x1 input is exactly
    # a matmul: y[n, p*C + c] = sum_ci z[n, ci] * W[ci, c, p].
    y = jnp.dot(z.astype(bf16), wdec_ref[...], preferred_element_type=f32)

    # GroupNorm(1, C): per-sample stats over all (C, 4, 4) elements, single
    # pass (E[y^2] - mean^2; safe: activations here are O(1)).
    n = y.shape[1]
    s1 = jnp.sum(y, axis=1, keepdims=True)
    s2 = jnp.sum(y * y, axis=1, keepdims=True)
    mean = s1 * (1.0 / n)
    var = s2 * (1.0 / n) - mean * mean
    yn = (y - mean) * lax.rsqrt(var + 1e-5)
    h = jnp.tanh(yn * gw_ref[...] + gb_ref[...]).astype(bf16)   # (tb, 16*C)

    # to_rgb1 (1x1 conv) + final tanh, one lane-aligned pixel block at a time.
    # wrgb is zero-padded to KPAD lanes so stores are full-width (unmasked).
    C = wrgb_ref.shape[0]
    wrgb = wrgb_ref[...]
    for p in range(16):
        blk = h[:, p * C:(p + 1) * C]                       # static, 128-aligned
        o_ref[:, p * KPAD:(p + 1) * KPAD] = jnp.tanh(
            jnp.dot(blk, wrgb, preferred_element_type=f32))


def preprocess_params(params):
    """One-time weight preprocessing (hoisted off the per-call path)."""
    C = params["fc2_w"].shape[0]              # layer_channel
    K = params["rgb1_w"].shape[0]             # output_channels
    w1 = params["fc1_w"].T.astype(jnp.bfloat16)                       # (cls, 128)
    w2 = params["fc2_w"].T.astype(jnp.bfloat16)                       # (128+samp, C)
    # ConvTranspose2d weight (C_in, C_out, 4, 4) -> spatial-major (C_in, 16*C_out)
    wdec = (jnp.transpose(params["deconv1_w"], (0, 2, 3, 1))
            .reshape(C, 16 * C).astype(jnp.bfloat16))
    gw = jnp.tile(params["gn1_w"], 16)[None, :].astype(jnp.float32)   # (1, 16*C)
    gb = jnp.tile(params["gn1_b"], 16)[None, :].astype(jnp.float32)
    wrgb = params["rgb1_w"].reshape(K, C).T                           # (C, K)
    wrgb = (jnp.zeros((C, KPAD), jnp.float32).at[:, :K].set(wrgb)
            .astype(jnp.bfloat16))                                    # lane-dense pad
    return {"w1": w1, "w2": w2, "wdec": wdec, "gw": gw, "gb": gb, "wrgb": wrgb}


@functools.partial(jax.jit, static_argnums=(2, 3))
def growing_generator_forward(x, pp, input_class_size, output_channels):
    B = x.shape[0]
    x1 = x[:, :input_class_size]
    x2 = x[:, input_class_size:]
    samp = x2.shape[1]

    # Batch grid: at toy B this is a single block; at large B it shards the
    # batch across TensorCores (v7x megacore) via the parallel axis.
    tile_b = B if B <= 128 else 128
    grid = (pl.cdiv(B, tile_b),)

    # TODO(synk): if layer_channel scales (wdec = C*16C bf16 bytes), tile the
    # z@wdec matmul over output columns with an extra grid axis to stay within
    # v7x's 64 MiB VMEM; unnecessary at C=128 (0.5 MiB).
    o = pl.pallas_call(
        fused_kernel,
        out_shape=jax.ShapeDtypeStruct((B, 16 * KPAD), jnp.float32),
        grid=grid,
        in_specs=[
            pl.BlockSpec((tile_b, input_class_size), lambda i: (i, 0)),
            pl.BlockSpec((tile_b, samp), lambda i: (i, 0)),
            pl.BlockSpec(pp["w1"].shape, lambda i: (0, 0)),
            pl.BlockSpec(pp["w2"].shape, lambda i: (0, 0)),
            pl.BlockSpec(pp["wdec"].shape, lambda i: (0, 0)),
            pl.BlockSpec(pp["gw"].shape, lambda i: (0, 0)),
            pl.BlockSpec(pp["gb"].shape, lambda i: (0, 0)),
            pl.BlockSpec(pp["wrgb"].shape, lambda i: (0, 0)),
        ],
        out_specs=pl.BlockSpec((tile_b, 16 * KPAD), lambda i: (i, 0)),
        compiler_params=pltpu.CompilerParams(
            dimension_semantics=("parallel",)),
    )(x1, x2, pp["w1"], pp["w2"], pp["wdec"], pp["gw"], pp["gb"], pp["wrgb"])

    # back to NCHW: (B, 16*KPAD) -> (B, 16, KPAD) -> slice K -> (B, 4, 4, K)
    # -> (B, K, 4, 4). Tiny (96-element) layout ops; kept for PyTorch parity.
    o = o.reshape(B, 16, KPAD)[:, :, :output_channels]
    o = o.reshape(B, 4, 4, output_channels)
    return jnp.transpose(o, (0, 3, 1, 2))


def reference_forward(x, params, input_class_size):
    """Pure-JAX f32 reference mirroring the PyTorch module (eval, size=4)."""
    x1 = x[:, :input_class_size]
    x2 = x[:, input_class_size:]
    a1 = jnp.tanh(x1 @ params["fc1_w"].T)
    z = jnp.tanh(jnp.concatenate([a1, x2], axis=1) @ params["fc2_w"].T)
    C = z.shape[1]
    y = jnp.einsum("nc,ckhw->nkhw", z, params["deconv1_w"])   # deconv on 1x1 in
    mean = y.mean(axis=(1, 2, 3), keepdims=True)
    var = ((y - mean) ** 2).mean(axis=(1, 2, 3), keepdims=True)
    yn = (y - mean) / jnp.sqrt(var + 1e-5)
    yn = yn * params["gn1_w"][None, :, None, None] + params["gn1_b"][None, :, None, None]
    h = jnp.tanh(yn)
    o = jnp.einsum("nchw,kc->nkhw", h, params["rgb1_w"].reshape(-1, C))
    return jnp.tanh(o)


if __name__ == "__main__":
    # Small but representative shapes (module hardcodes fc_1 out = 128).
    B = 2
    input_class_size = 10
    sampling_size = 128
    layer_channel = 128
    output_channels = 3

    key = jax.random.PRNGKey(0)
    ks = jax.random.split(key, 8)
    params = {
        "fc1_w": 0.1 * jax.random.normal(ks[0], (FC1_OUT, input_class_size), jnp.float32),
        "fc2_w": 0.1 * jax.random.normal(ks[1], (layer_channel, FC1_OUT + sampling_size), jnp.float32),
        "deconv1_w": 0.1 * jax.random.normal(ks[2], (layer_channel, layer_channel, 4, 4), jnp.float32),
        "gn1_w": 1.0 + 0.1 * jax.random.normal(ks[3], (layer_channel,), jnp.float32),
        "gn1_b": 0.1 * jax.random.normal(ks[4], (layer_channel,), jnp.float32),
        "rgb1_w": 0.1 * jax.random.normal(ks[5], (output_channels, layer_channel, 1, 1), jnp.float32),
    }
    x = jax.random.normal(ks[6], (B, input_class_size + sampling_size), jnp.float32)

    # TODO(synk): NoiseLayer (training-mode Gaussian noise) and the
    # alpha-blend / upsample transition path are not exercised at the module's
    # default inference configuration (eval, output_size=4, is_transitioning=False).

    pp = preprocess_params(params)          # hoisted: runs once at load time
    pp = jax.block_until_ready(pp)

    out = growing_generator_forward(x, pp, input_class_size, output_channels)
    out = jax.block_until_ready(out)

    ref = reference_forward(x, params, input_class_size)
    assert out.shape == (B, output_channels, 4, 4), out.shape
    max_err = float(jnp.max(jnp.abs(out - ref)))
    # bf16 matmul operands (f32 accumulation) => looser tolerance vs f32 ref.
    assert max_err < 3e-2, max_err
    print("KERNEL_OK")
</pallas_src>

<mosaic_0001>
module attributes {stable_mosaic.version = 11 : i64} {
  func.func @fused_kernel(%arg0: i32, %arg1: memref<2x10xf32, #tpu.memory_space<vmem>>, %arg2: memref<2x128xf32, #tpu.memory_space<vmem>>, %arg3: memref<10x128xbf16, #tpu.memory_space<vmem>>, %arg4: memref<256x128xbf16, #tpu.memory_space<vmem>>, %arg5: memref<128x2048xbf16, #tpu.memory_space<vmem>>, %arg6: memref<1x2048xf32, #tpu.memory_space<vmem>>, %arg7: memref<1x2048xf32, #tpu.memory_space<vmem>>, %arg8: memref<128x128xbf16, #tpu.memory_space<vmem>>, %arg9: memref<2x2048xf32, #tpu.memory_space<vmem>>) attributes {dimension_semantics = [#tpu.dimension_semantics<parallel>], iteration_bounds = array<i64: 1>, scalar_prefetch = 0 : i64, scratch_operands = 0 : i64, tpu.core_type = #tpu.core_type<tc>, window_params = [{transform_indices = @transform_0, window_bounds = array<i64: 2, 10>}, {transform_indices = @transform_1, window_bounds = array<i64: 2, 128>}, {pipeline_mode = #tpu.pipeline_mode<synchronous>, transform_indices = @transform_2, window_bounds = array<i64: 10, 128>}, {pipeline_mode = #tpu.pipeline_mode<synchronous>, transform_indices = @transform_3, window_bounds = array<i64: 256, 128>}, {pipeline_mode = #tpu.pipeline_mode<synchronous>, transform_indices = @transform_4, window_bounds = array<i64: 128, 2048>}, {pipeline_mode = #tpu.pipeline_mode<synchronous>, transform_indices = @transform_5, window_bounds = array<i64: 1, 2048>}, {pipeline_mode = #tpu.pipeline_mode<synchronous>, transform_indices = @transform_6, window_bounds = array<i64: 1, 2048>}, {pipeline_mode = #tpu.pipeline_mode<synchronous>, transform_indices = @transform_7, window_bounds = array<i64: 128, 128>}, {transform_indices = @transform_8, window_bounds = array<i64: 2, 2048>}]} {
    %c0 = arith.constant 0 : index
    %c0_0 = arith.constant 0 : index
    %0 = vector.load %arg1[%c0, %c0_0] : memref<2x10xf32, #tpu.memory_space<vmem>>, vector<2x10xf32>
    %1 = arith.truncf %0 : vector<2x10xf32> to vector<2x10xbf16>
    %c0_1 = arith.constant 0 : index
    %c0_2 = arith.constant 0 : index
    %2 = vector.load %arg3[%c0_1, %c0_2] : memref<10x128xbf16, #tpu.memory_space<vmem>>, vector<10x128xbf16>
    %cst = arith.constant dense<0.000000e+00> : vector<2x128xf32>
    %3 = tpu.matmul %1, %2, %cst {dimension_numbers = #tpu.dot_dimension_numbers<[1], [0], [0], [1], [0, 0, 1, 1], [], []>} : vector<2x10xbf16>, vector<10x128xbf16>, vector<2x128xf32> -> vector<2x128xf32>
    %4 = math.tanh %3 : vector<2x128xf32>
    %c0_3 = arith.constant 0 : index
    %c0_4 = arith.constant 0 : index
    %5 = vector.load %arg2[%c0_3, %c0_4] : memref<2x128xf32, #tpu.memory_space<vmem>>, vector<2x128xf32>
    %6 = tpu.concatenate %4, %5 in 1 : vector<2x128xf32>, vector<2x128xf32> -> vector<2x256xf32>
    %7 = arith.truncf %6 : vector<2x256xf32> to vector<2x256xbf16>
    %c0_5 = arith.constant 0 : index
    %c0_6 = arith.constant 0 : index
    %8 = vector.load %arg4[%c0_5, %c0_6] : memref<256x128xbf16, #tpu.memory_space<vmem>>, vector<256x128xbf16>
    %cst_7 = arith.constant dense<0.000000e+00> : vector<2x128xf32>
    %9 = tpu.matmul %7, %8, %cst_7 {dimension_numbers = #tpu.dot_dimension_numbers<[1], [0], [0], [1], [0, 0, 1, 1], [], []>} : vector<2x256xbf16>, vector<256x128xbf16>, vector<2x128xf32> -> vector<2x128xf32>
    %10 = math.tanh %9 : vector<2x128xf32>
    %11 = arith.truncf %10 : vector<2x128xf32> to vector<2x128xbf16>
    %c0_8 = arith.constant 0 : index
    %c0_9 = arith.constant 0 : index
    %12 = vector.load %arg5[%c0_8, %c0_9] : memref<128x2048xbf16, #tpu.memory_space<vmem>>, vector<128x2048xbf16>
    %cst_10 = arith.constant dense<0.000000e+00> : vector<2x2048xf32>
    %13 = tpu.matmul %11, %12, %cst_10 {dimension_numbers = #tpu.dot_dimension_numbers<[1], [0], [0], [1], [0, 0, 1, 1], [], []>} : vector<2x128xbf16>, vector<128x2048xbf16>, vector<2x2048xf32> -> vector<2x2048xf32>
    %cst_11 = arith.constant dense<0.000000e+00> : vector<2xf32>
    %14 = vector.multi_reduction <add>, %13, %cst_11 [1] : vector<2x2048xf32> to vector<2xf32>
    %15 = vector.shape_cast %14 : vector<2xf32> to vector<2x1xf32>
    %16 = arith.mulf %13, %13 : vector<2x2048xf32>
    %cst_12 = arith.constant dense<0.000000e+00> : vector<2xf32>
    %17 = vector.multi_reduction <add>, %16, %cst_12 [1] : vector<2x2048xf32> to vector<2xf32>
    %18 = vector.shape_cast %17 : vector<2xf32> to vector<2x1xf32>
    %cst_13 = arith.constant 4.8828125E-4 : f32
    %19 = vector.broadcast %cst_13 : f32 to vector<2x1xf32>
    %20 = arith.mulf %15, %19 : vector<2x1xf32>
    %cst_14 = arith.constant 4.8828125E-4 : f32
    %21 = vector.broadcast %cst_14 : f32 to vector<2x1xf32>
    %22 = arith.mulf %18, %21 : vector<2x1xf32>
    %23 = arith.mulf %20, %20 : vector<2x1xf32>
    %24 = arith.subf %22, %23 : vector<2x1xf32>
    %25 = vector.broadcast %20 : vector<2x1xf32> to vector<2x2048xf32>
    %26 = arith.subf %13, %25 : vector<2x2048xf32>
    %cst_15 = arith.constant 9.99999974E-6 : f32
    %27 = vector.broadcast %cst_15 : f32 to vector<2x1xf32>
    %28 = arith.addf %24, %27 : vector<2x1xf32>
    %29 = math.rsqrt %28 : vector<2x1xf32>
    %30 = vector.broadcast %29 : vector<2x1xf32> to vector<2x2048xf32>
    %31 = arith.mulf %26, %30 : vector<2x2048xf32>
    %c0_16 = arith.constant 0 : index
    %c0_17 = arith.constant 0 : index
    %32 = vector.load %arg6[%c0_16, %c0_17] : memref<1x2048xf32, #tpu.memory_space<vmem>>, vector<1x2048xf32>
    %33 = vector.broadcast %32 : vector<1x2048xf32> to vector<2x2048xf32>
    %34 = arith.mulf %31, %33 : vector<2x2048xf32>
    %c0_18 = arith.constant 0 : index
    %c0_19 = arith.constant 0 : index
    %35 = vector.load %arg7[%c0_18, %c0_19] : memref<1x2048xf32, #tpu.memory_space<vmem>>, vector<1x2048xf32>
    %36 = vector.broadcast %35 : vector<1x2048xf32> to vector<2x2048xf32>
    %37 = arith.addf %34, %36 : vector<2x2048xf32>
    %38 = math.tanh %37 : vector<2x2048xf32>
    %39 = arith.truncf %38 : vector<2x2048xf32> to vector<2x2048xbf16>
    %c0_20 = arith.constant 0 : index
    %c0_21 = arith.constant 0 : index
    %40 = vector.load %arg8[%c0_20, %c0_21] : memref<128x128xbf16, #tpu.memory_space<vmem>>, vector<128x128xbf16>
    %41 = vector.extract_strided_slice %39 {offsets = [0, 0], sizes = [2, 128], strides = [1, 1]} : vector<2x2048xbf16> to vector<2x128xbf16>
    %cst_22 = arith.constant dense<0.000000e+00> : vector<2x128xf32>
    %42 = tpu.matmul %41, %40, %cst_22 {dimension_numbers = #tpu.dot_dimension_numbers<[1], [0], [0], [1], [0, 0, 1, 1], [], []>} : vector<2x128xbf16>, vector<128x128xbf16>, vector<2x128xf32> -> vector<2x128xf32>
    %43 = math.tanh %42 : vector<2x128xf32>
    %c0_23 = arith.constant 0 : index
    %c0_24 = arith.constant 0 : index
    %44 = vector.load %arg9[%c0_23, %c0_24] : memref<2x2048xf32, #tpu.memory_space<vmem>>, vector<2x128xf32>
    tpu.vector_store %arg9[%c0_23, %c0_24], %43 {strides = array<i32>} : memref<2x2048xf32, #tpu.memory_space<vmem>>, vector<2x128xf32>,
    %45 = vector.extract_strided_slice %39 {offsets = [0, 128], sizes = [2, 128], strides = [1, 1]} : vector<2x2048xbf16> to vector<2x128xbf16>
    %cst_25 = arith.constant dense<0.000000e+00> : vector<2x128xf32>
    %46 = tpu.matmul %45, %40, %cst_25 {dimension_numbers = #tpu.dot_dimension_numbers<[1], [0], [0], [1], [0, 0, 1, 1], [], []>} : vector<2x128xbf16>, vector<128x128xbf16>, vector<2x128xf32> -> vector<2x128xf32>
    %47 = math.tanh %46 : vector<2x128xf32>
    %c0_26 = arith.constant 0 : index
    %c128 = arith.constant 128 : index
    %48 = vector.load %arg9[%c0_26, %c128] : memref<2x2048xf32, #tpu.memory_space<vmem>>, vector<2x128xf32>
    tpu.vector_store %arg9[%c0_26, %c128], %47 {strides = array<i32>} : memref<2x2048xf32, #tpu.memory_space<vmem>>, vector<2x128xf32>,
    %49 = vector.extract_strided_slice %39 {offsets = [0, 256], sizes = [2, 128], strides = [1, 1]} : vector<2x2048xbf16> to vector<2x128xbf16>
    %cst_27 = arith.constant dense<0.000000e+00> : vector<2x128xf32>
    %50 = tpu.matmul %49, %40, %cst_27 {dimension_numbers = #tpu.dot_dimension_numbers<[1], [0], [0], [1], [0, 0, 1, 1], [], []>} : vector<2x128xbf16>, vector<128x128xbf16>, vector<2x128xf32> -> vector<2x128xf32>
    %51 = math.tanh %50 : vector<2x128xf32>
    %c0_28 = arith.constant 0 : index
    %c256 = arith.constant 256 : index
    %52 = vector.load %arg9[%c0_28, %c256] : memref<2x2048xf32, #tpu.memory_space<vmem>>, vector<2x128xf32>
    tpu.vector_store %arg9[%c0_28, %c256], %51 {strides = array<i32>} : memref<2x2048xf32, #tpu.memory_space<vmem>>, vector<2x128xf32>,
    %53 = vector.extract_strided_slice %39 {offsets = [0, 384], sizes = [2, 128], strides = [1, 1]} : vector<2x2048xbf16> to vector<2x128xbf16>
    %cst_29 = arith.constant dense<0.000000e+00> : vector<2x128xf32>
    %54 = tpu.matmul %53, %40, %cst_29 {dimension_numbers = #tpu.dot_dimension_numbers<[1], [0], [0], [1], [0, 0, 1, 1], [], []>} : vector<2x128xbf16>, vector<128x128xbf16>, vector<2x128xf32> -> vector<2x128xf32>
    %55 = math.tanh %54 : vector<2x128xf32>
    %c0_30 = arith.constant 0 : index
    %c384 = arith.constant 384 : index
    %56 = vector.load %arg9[%c0_30, %c384] : memref<2x2048xf32, #tpu.memory_space<vmem>>, vector<2x128xf32>
    tpu.vector_store %arg9[%c0_30, %c384], %55 {strides = array<i32>} : memref<2x2048xf32, #tpu.memory_space<vmem>>, vector<2x128xf32>,
    %57 = vector.extract_strided_slice %39 {offsets = [0, 512], sizes = [2, 128], strides = [1, 1]} : vector<2x2048xbf16> to vector<2x128xbf16>
    %cst_31 = arith.constant dense<0.000000e+00> : vector<2x128xf32>
    %58 = tpu.matmul %57, %40, %cst_31 {dimension_numbers = #tpu.dot_dimension_numbers<[1], [0], [0], [1], [0, 0, 1, 1], [], []>} : vector<2x128xbf16>, vector<128x128xbf16>, vector<2x128xf32> -> vector<2x128xf32>
    %59 = math.tanh %58 : vector<2x128xf32>
    %c0_32 = arith.constant 0 : index
    %c512 = arith.constant 512 : index
    %60 = vector.load %arg9[%c0_32, %c512] : memref<2x2048xf32, #tpu.memory_space<vmem>>, vector<2x128xf32>
    tpu.vector_store %arg9[%c0_32, %c512], %59 {strides = array<i32>} : memref<2x2048xf32, #tpu.memory_space<vmem>>, vector<2x128xf32>,
    %61 = vector.extract_strided_slice %39 {offsets = [0, 640], sizes = [2, 128], strides = [1, 1]} : vector<2x2048xbf16> to vector<2x128xbf16>
    %cst_33 = arith.constant dense<0.000000e+00> : vector<2x128xf32>
    %62 = tpu.matmul %61, %40, %cst_33 {dimension_numbers = #tpu.dot_dimension_numbers<[1], [0], [0], [1], [0, 0, 1, 1], [], []>} : vector<2x128xbf16>, vector<128x128xbf16>, vector<2x128xf32> -> vector<2x128xf32>
    %63 = math.tanh %62 : vector<2x128xf32>
    %c0_34 = arith.constant 0 : index
    %c640 = arith.constant 640 : index
    %64 = vector.load %arg9[%c0_34, %c640] : memref<2x2048xf32, #tpu.memory_space<vmem>>, vector<2x128xf32>
    tpu.vector_store %arg9[%c0_34, %c640], %63 {strides = array<i32>} : memref<2x2048xf32, #tpu.memory_space<vmem>>, vector<2x128xf32>,
    %65 = vector.extract_strided_slice %39 {offsets = [0, 768], sizes = [2, 128], strides = [1, 1]} : vector<2x2048xbf16> to vector<2x128xbf16>
    %cst_35 = arith.constant dense<0.000000e+00> : vector<2x128xf32>
    %66 = tpu.matmul %65, %40, %cst_35 {dimension_numbers = #tpu.dot_dimension_numbers<[1], [0], [0], [1], [0, 0, 1, 1], [], []>} : vector<2x128xbf16>, vector<128x128xbf16>, vector<2x128xf32> -> vector<2x128xf32>
    %67 = math.tanh %66 : vector<2x128xf32>
    %c0_36 = arith.constant 0 : index
    %c768 = arith.constant 768 : index
    %68 = vector.load %arg9[%c0_36, %c768] : memref<2x2048xf32, #tpu.memory_space<vmem>>, vector<2x128xf32>
    tpu.vector_store %arg9[%c0_36, %c768], %67 {strides = array<i32>} : memref<2x2048xf32, #tpu.memory_space<vmem>>, vector<2x128xf32>,
    %69 = vector.extract_strided_slice %39 {offsets = [0, 896], sizes = [2, 128], strides = [1, 1]} : vector<2x2048xbf16> to vector<2x128xbf16>
    %cst_37 = arith.constant dense<0.000000e+00> : vector<2x128xf32>
    %70 = tpu.matmul %69, %40, %cst_37 {dimension_numbers = #tpu.dot_dimension_numbers<[1], [0], [0], [1], [0, 0, 1, 1], [], []>} : vector<2x128xbf16>, vector<128x128xbf16>, vector<2x128xf32> -> vector<2x128xf32>
    %71 = math.tanh %70 : vector<2x128xf32>
    %c0_38 = arith.constant 0 : index
    %c896 = arith.constant 896 : index
    %72 = vector.load %arg9[%c0_38, %c896] : memref<2x2048xf32, #tpu.memory_space<vmem>>, vector<2x128xf32>
    tpu.vector_store %arg9[%c0_38, %c896], %71 {strides = array<i32>} : memref<2x2048xf32, #tpu.memory_space<vmem>>, vector<2x128xf32>,
    %73 = vector.extract_strided_slice %39 {offsets = [0, 1024], sizes = [2, 128], strides = [1, 1]} : vector<2x2048xbf16> to vector<2x128xbf16>
    %cst_39 = arith.constant dense<0.000000e+00> : vector<2x128xf32>
    %74 = tpu.matmul %73, %40, %cst_39 {dimension_numbers = #tpu.dot_dimension_numbers<[1], [0], [0], [1], [0, 0, 1, 1], [], []>} : vector<2x128xbf16>, vector<128x128xbf16>, vector<2x128xf32> -> vector<2x128xf32>
    %75 = math.tanh %74 : vector<2x128xf32>
    %c0_40 = arith.constant 0 : index
    %c1024 = arith.constant 1024 : index
    %76 = vector.load %arg9[%c0_40, %c1024] : memref<2x2048xf32, #tpu.memory_space<vmem>>, vector<2x128xf32>
    tpu.vector_store %arg9[%c0_40, %c1024], %75 {strides = array<i32>} : memref<2x2048xf32, #tpu.memory_space<vmem>>, vector<2x128xf32>,
    %77 = vector.extract_strided_slice %39 {offsets = [0, 1152], sizes = [2, 128], strides = [1, 1]} : vector<2x2048xbf16> to vector<2x128xbf16>
    %cst_41 = arith.constant dense<0.000000e+00> : vector<2x128xf32>
    %78 = tpu.matmul %77, %40, %cst_41 {dimension_numbers = #tpu.dot_dimension_numbers<[1], [0], [0], [1], [0, 0, 1, 1], [], []>} : vector<2x128xbf16>, vector<128x128xbf16>, vector<2x128xf32> -> vector<2x128xf32>
    %79 = math.tanh %78 : vector<2x128xf32>
    %c0_42 = arith.constant 0 : index
    %c1152 = arith.constant 1152 : index
    %80 = vector.load %arg9[%c0_42, %c1152] : memref<2x2048xf32, #tpu.memory_space<vmem>>, vector<2x128xf32>
    tpu.vector_store %arg9[%c0_42, %c1152], %79 {strides = array<i32>} : memref<2x2048xf32, #tpu.memory_space<vmem>>, vector<2x128xf32>,
    %81 = vector.extract_strided_slice %39 {offsets = [0, 1280], sizes = [2, 128], strides = [1, 1]} : vector<2x2048xbf16> to vector<2x128xbf16>
    %cst_43 = arith.constant dense<0.000000e+00> : vector<2x128xf32>
    %82 = tpu.matmul %81, %40, %cst_43 {dimension_numbers = #tpu.dot_dimension_numbers<[1], [0], [0], [1], [0, 0, 1, 1], [], []>} : vector<2x128xbf16>, vector<128x128xbf16>, vector<2x128xf32> -> vector<2x128xf32>
    %83 = math.tanh %82 : vector<2x128xf32>
    %c0_44 = arith.constant 0 : index
    %c1280 = arith.constant 1280 : index
    %84 = vector.load %arg9[%c0_44, %c1280] : memref<2x2048xf32, #tpu.memory_space<vmem>>, vector<2x128xf32>
    tpu.vector_store %arg9[%c0_44, %c1280], %83 {strides = array<i32>} : memref<2x2048xf32, #tpu.memory_space<vmem>>, vector<2x128xf32>,
    %85 = vector.extract_strided_slice %39 {offsets = [0, 1408], sizes = [2, 128], strides = [1, 1]} : vector<2x2048xbf16> to vector<2x128xbf16>
    %cst_45 = arith.constant dense<0.000000e+00> : vector<2x128xf32>
    %86 = tpu.matmul %85, %40, %cst_45 {dimension_numbers = #tpu.dot_dimension_numbers<[1], [0], [0], [1], [0, 0, 1, 1], [], []>} : vector<2x128xbf16>, vector<128x128xbf16>, vector<2x128xf32> -> vector<2x128xf32>
    %87 = math.tanh %86 : vector<2x128xf32>
    %c0_46 = arith.constant 0 : index
    %c1408 = arith.constant 1408 : index
    %88 = vector.load %arg9[%c0_46, %c1408] : memref<2x2048xf32, #tpu.memory_space<vmem>>, vector<2x128xf32>
    tpu.vector_store %arg9[%c0_46, %c1408], %87 {strides = array<i32>} : memref<2x2048xf32, #tpu.memory_space<vmem>>, vector<2x128xf32>,
    %89 = vector.extract_strided_slice %39 {offsets = [0, 1536], sizes = [2, 128], strides = [1, 1]} : vector<2x2048xbf16> to vector<2x128xbf16>
    %cst_47 = arith.constant dense<0.000000e+00> : vector<2x128xf32>
    %90 = tpu.matmul %89, %40, %cst_47 {dimension_numbers = #tpu.dot_dimension_numbers<[1], [0], [0], [1], [0, 0, 1, 1], [], []>} : vector<2x128xbf16>, vector<128x128xbf16>, vector<2x128xf32> -> vector<2x128xf32>
    %91 = math.tanh %90 : vector<2x128xf32>
    %c0_48 = arith.constant 0 : index
    %c1536 = arith.constant 1536 : index
    %92 = vector.load %arg9[%c0_48, %c1536] : memref<2x2048xf32, #tpu.memory_space<vmem>>, vector<2x128xf32>
    tpu.vector_store %arg9[%c0_48, %c1536], %91 {strides = array<i32>} : memref<2x2048xf32, #tpu.memory_space<vmem>>, vector<2x128xf32>,
    %93 = vector.extract_strided_slice %39 {offsets = [0, 1664], sizes = [2, 128], strides = [1, 1]} : vector<2x2048xbf16> to vector<2x128xbf16>
    %cst_49 = arith.constant dense<0.000000e+00> : vector<2x128xf32>
    %94 = tpu.matmul %93, %40, %cst_49 {dimension_numbers = #tpu.dot_dimension_numbers<[1], [0], [0], [1], [0, 0, 1, 1], [], []>} : vector<2x128xbf16>, vector<128x128xbf16>, vector<2x128xf32> -> vector<2x128xf32>
    %95 = math.tanh %94 : vector<2x128xf32>
    %c0_50 = arith.constant 0 : index
    %c1664 = arith.constant 1664 : index
    %96 = vector.load %arg9[%c0_50, %c1664] : memref<2x2048xf32, #tpu.memory_space<vmem>>, vector<2x128xf32>
    tpu.vector_store %arg9[%c0_50, %c1664], %95 {strides = array<i32>} : memref<2x2048xf32, #tpu.memory_space<vmem>>, vector<2x128xf32>,
    %97 = vector.extract_strided_slice %39 {offsets = [0, 1792], sizes = [2, 128], strides = [1, 1]} : vector<2x2048xbf16> to vector<2x128xbf16>
    %cst_51 = arith.constant dense<0.000000e+00> : vector<2x128xf32>
    %98 = tpu.matmul %97, %40, %cst_51 {dimension_numbers = #tpu.dot_dimension_numbers<[1], [0], [0], [1], [0, 0, 1, 1], [], []>} : vector<2x128xbf16>, vector<128x128xbf16>, vector<2x128xf32> -> vector<2x128xf32>
    %99 = math.tanh %98 : vector<2x128xf32>
    %c0_52 = arith.constant 0 : index
    %c1792 = arith.constant 1792 : index
    %100 = vector.load %arg9[%c0_52, %c1792] : memref<2x2048xf32, #tpu.memory_space<vmem>>, vector<2x128xf32>
    tpu.vector_store %arg9[%c0_52, %c1792], %99 {strides = array<i32>} : memref<2x2048xf32, #tpu.memory_space<vmem>>, vector<2x128xf32>,
    %101 = vector.extract_strided_slice %39 {offsets = [0, 1920], sizes = [2, 128], strides = [1, 1]} : vector<2x2048xbf16> to vector<2x128xbf16>
    %cst_53 = arith.constant dense<0.000000e+00> : vector<2x128xf32>
    %102 = tpu.matmul %101, %40, %cst_53 {dimension_numbers = #tpu.dot_dimension_numbers<[1], [0], [0], [1], [0, 0, 1, 1], [], []>} : vector<2x128xbf16>, vector<128x128xbf16>, vector<2x128xf32> -> vector<2x128xf32>
    %103 = math.tanh %102 : vector<2x128xf32>
    %c0_54 = arith.constant 0 : index
    %c1920 = arith.constant 1920 : index
    %104 = vector.load %arg9[%c0_54, %c1920] : memref<2x2048xf32, #tpu.memory_space<vmem>>, vector<2x128xf32>
    tpu.vector_store %arg9[%c0_54, %c1920], %103 {strides = array<i32>} : memref<2x2048xf32, #tpu.memory_space<vmem>>, vector<2x128xf32>,
    return
  }
  func.func @transform_0(%arg0: i32) -> (i32, i32) {
    %c0_i32 = arith.constant 0 : i32
    %c0_i32_0 = arith.constant 0 : i32
    return %arg0, %c0_i32 : i32, i32
  }
  func.func @transform_1(%arg0: i32) -> (i32, i32) {
    %c0_i32 = arith.constant 0 : i32
    %c0_i32_0 = arith.constant 0 : i32
    return %arg0, %c0_i32 : i32, i32
  }
  func.func @transform_2(%arg0: i32) -> (i32, i32) {
    %c0_i32 = arith.constant 0 : i32
    %c0_i32_0 = arith.constant 0 : i32
    %c0_i32_1 = arith.constant 0 : i32
    return %c0_i32, %c0_i32_0 : i32, i32
  }
  func.func @transform_3(%arg0: i32) -> (i32, i32) {
    %c0_i32 = arith.constant 0 : i32
    %c0_i32_0 = arith.constant 0 : i32
    %c0_i32_1 = arith.constant 0 : i32
    return %c0_i32, %c0_i32_0 : i32, i32
  }
  func.func @transform_4(%arg0: i32) -> (i32, i32) {
    %c0_i32 = arith.constant 0 : i32
    %c0_i32_0 = arith.constant 0 : i32
    %c0_i32_1 = arith.constant 0 : i32
    return %c0_i32, %c0_i32_0 : i32, i32
  }
  func.func @transform_5(%arg0: i32) -> (i32, i32) {
    %c0_i32 = arith.constant 0 : i32
    %c0_i32_0 = arith.constant 0 : i32
    %c0_i32_1 = arith.constant 0 : i32
    return %c0_i32, %c0_i32_0 : i32, i32
  }
  func.func @transform_6(%arg0: i32) -> (i32, i32) {
    %c0_i32 = arith.constant 0 : i32
    %c0_i32_0 = arith.constant 0 : i32
    %c0_i32_1 = arith.constant 0 : i32
    return %c0_i32, %c0_i32_0 : i32, i32
  }
  func.func @transform_7(%arg0: i32) -> (i32, i32) {
    %c0_i32 = arith.constant 0 : i32
    %c0_i32_0 = arith.constant 0 : i32
    %c0_i32_1 = arith.constant 0 : i32
    return %c0_i32, %c0_i32_0 : i32, i32
  }
  func.func @transform_8(%arg0: i32) -> (i32, i32) {
    %c0_i32 = arith.constant 0 : i32
    %c0_i32_0 = arith.constant 0 : i32
    return %arg0, %c0_i32 : i32, i32
  }
}

</mosaic_0001>

<bundles_post_ra>
// kernel: growing_generator_forward.1
= control target key start
LH: loop header
LB: loop body
LE: loop exit
PB: predicated region body
PF: predicated region fallthrough
CT: control target
= control target key end

     0   :  { %13 = vsyncpa [#allocation3], 0  ;;  %s4173_s0 = inlined_call_operand.vmem [shape: f32[2,10], index: 0, kind: input, shape index: {}]   ;;  %s4174_s1 = inlined_call_operand.vmem [shape: f32[2,128], index: 1, kind: input, shape index: {}]   ;;  %s4175_s2 = inlined_call_operand.vmem [shape: bf16[10,128], index: 2, kind: input, shape index: {}]   ;;  %s4176_s3 = inlined_call_operand.hbm [shape: bf16[256,128], index: 3, kind: input, shape index: {}]   ;;  %s4177_s4 = inlined_call_operand.hbm [shape: bf16[128,2048], index: 4, kind: input, shape index: {}]   ;;  %s4178_s5 = inlined_call_operand.hbm [shape: f32[1,2048], index: 5, kind: input, shape index: {}]   ;;  %s4179_s6 = inlined_call_operand.hbm [shape: f32[1,2048], index: 6, kind: input, shape index: {}]   ;;  %s4180_s7 = inlined_call_operand.hbm [shape: bf16[128,128], index: 7, kind: input, shape index: {}]   ;;  %s4181_s8 = inlined_call_operand.vmem [shape: f32[2,2048], index: 8, kind: output, shape index: {}]  }
   0x1   :  { %14 = vsyncpa [#allocation5], 0 }
   0x2   :  { %15 = vsyncpa [#allocation8], 0  ;;  %s3377_s27 = smov [#allocation4]  }
   0x3   :  { %s39_s28 = sshll.u32 %s3377_s27, 4  ;;  %s40_s28 = int_to_ptr.vmem [resolvable:$true] %s39_s28 }
   0x4   :  { %s3279_s29 = scalar_lea.vmem %s40_s28, 16384  ;;  %p3284_p1 = scmp.lt.s32.totalorder %s40_s28, %s40_s28 }
   0x5   :  { %p3280_p0 = scmp.ne.s32.totalorder %s40_s28, %s3279_s29  ;;  %p3285_p2 = scmp.lt.s32.totalorder %s3279_s29, %s3279_s29 }
   0x7   :  { %p3286_p3 = por %p3285_p2, %p3284_p1 }
   0x9   :  { %p3287_p4 = pnand %p3286_p3, %p3280_p0 }
   0xb   :  { %3290 = shalt.err (!%p3287_p4)
}
   0xc   :  { %s3378_s30 = smov 1024   ;;  %s3379_s9 = smov 64  }
   0xd   :  { %45 = dma.hbm_to_vmem [thread:$0]  %s4177_s4, 16384, %s40_s28, [#allocation5], %s3378_s30, %s3378_s30, %s3379_s9  }
   0xe   :  { %s3380_s12 = smov [#allocation7]   ;;  %s3381_s14 = smov [#allocation2]  }
   0xf   :  { %s62_s13 = sshll.u32 %s3380_s12, 4  ;;  %s27_s15 = sshll.u32 %s3381_s14, 4  ;;  %s63_s13 = int_to_ptr.vmem [resolvable:$true] %s62_s13  ;;  %s28_s15 = int_to_ptr.vmem [resolvable:$true] %s27_s15 }
  0x10   :  { %s3299_s16 = scalar_lea.vmem %s63_s13, 256  ;;  %p3304_p6 = scmp.lt.s32.totalorder %s63_s13, %s63_s13 }
  0x11   :  { %p3300_p5 = scmp.ne.s32.totalorder %s63_s13, %s3299_s16  ;;  %p3305_p7 = scmp.lt.s32.totalorder %s3299_s16, %s3299_s16 }
  0x13   :  { %p3306_p8 = por %p3305_p7, %p3304_p6 }
  0x15   :  { %p3307_p9 = pnand %p3306_p8, %p3300_p5 }
  0x17   :  { %3310 = shalt.err (!%p3307_p9)
}
  0x18   :  { %65 = dma.hbm_to_vmem [thread:$0]  %s4179_s6, 256, %s63_s13, [#allocation8]  }
  0x19   :  { %s3319_s19 = scalar_lea.vmem %s28_s15, 2048  ;;  %p3324_p11 = scmp.lt.s32.totalorder %s28_s15, %s28_s15 }
  0x1a   :  { %p3320_p10 = scmp.ne.s32.totalorder %s28_s15, %s3319_s19  ;;  %p3325_p12 = scmp.lt.s32.totalorder %s3319_s19, %s3319_s19 }
  0x1c   :  { %p3326_p13 = por %p3325_p12, %p3324_p11 }
  0x1e   :  { %p3327_p0 = pnand %p3326_p13, %p3320_p10 }
  0x20   :  { %3330 = shalt.err (!%p3327_p0)
}
  0x21   :  { %s3382_s4 = smov 4   ;;  %s3383_s22 = smov [#allocation6]  }
  0x22   :  { %33 = dma.hbm_to_vmem [thread:$0]  %s4176_s3, 2048, %s28_s15, [#allocation3], %s3379_s9, %s3379_s9, %s3382_s4  }
  0x23   :  { %s52_s23 = sshll.u32 %s3383_s22, 4  ;;  %s3384_s24 = smov [#allocation9]   ;;  %s53_s23 = int_to_ptr.vmem [resolvable:$true] %s52_s23 }
  0x24   :  { %s71_s25 = sshll.u32 %s3384_s24, 4  ;;  %s3339_s6 = scalar_lea.vmem %s53_s23, 256  ;;  %s72_s25 = int_to_ptr.vmem [resolvable:$true] %s71_s25 }
  0x25   :  { %p3340_p1 = scmp.ne.s32.totalorder %s53_s23, %s3339_s6  ;;  %p3344_p2 = scmp.lt.s32.totalorder %s53_s23, %s53_s23 }
  0x26   :  { %p3345_p3 = scmp.lt.s32.totalorder %s3339_s6, %s3339_s6 }
  0x28   :  { %p3346_p4 = por %p3345_p3, %p3344_p2 }
  0x2a   :  { %p3347_p5 = pnand %p3346_p4, %p3340_p1 }
  0x2c   :  { %3350 = shalt.err (!%p3347_p5)
}
  0x2d   :  { %55 = dma.hbm_to_vmem [thread:$0]  %s4178_s5, 256, %s53_s23, [#allocation5]  }
  0x2e   :  { %s3359_s28 = scalar_lea.vmem %s72_s25, 1024  ;;  %p3364_p7 = scmp.lt.s32.totalorder %s72_s25, %s72_s25 }
  0x2f   :  { %p3360_p6 = scmp.ne.s32.totalorder %s72_s25, %s3359_s28  ;;  %p3365_p8 = scmp.lt.s32.totalorder %s3359_s28, %s3359_s28 }
  0x31   :  { %p3366_p9 = por %p3365_p8, %p3364_p7 }
  0x33   :  { %p3367_p10 = pnand %p3366_p9, %p3360_p6 }
  0x35   :  { %3370 = shalt.err (!%p3367_p10)
}
  0x36   :  { %77 = dma.hbm_to_vmem [thread:$0]  %s4180_s7, 1024, %s72_s25, [#allocation8], %s3379_s9, %s3379_s9, %s3382_s4  }
  0x37   :  { %3371 = dma.done.wait [#allocation3], 2048  }
  0x38   :  { %3372 = vsyncadd [#allocation3], 4294965248 }
  0x39   :  { %3373 = dma.done.wait [#allocation5], 16640  }
  0x3a   :  { %3374 = vsyncadd [#allocation5], 4294950656 }
  0x3b   :  { %3375 = dma.done.wait [#allocation8], 1280  }
  0x3c   :  { %3376 = vsyncadd [#allocation8], 4294966016  ;;  %v4182_v0 = vmov 0.0   ;;  %vm3386_vm0 = vmmov 0   ;;  %vm107_vm1 = vcmask 1044480   ;;  %v3177_v5 = vld [vmem:[#allocation2 + $0x78] sm:$0xff]  }
  0x3d   :  { %2839 = vmatprep.subr.bf16.mxu0 %v4182_v0  ;;  %2841 = vmatprep.mubr.msk.bf16.mxu0 %vm3386_vm0, %v4182_v0  ;;  %v3176_v1 = vld [vmem:[%s4175_s2] sm:$0x1f]   ;;  %vm103_vm2 = vcmask 80896   ;;  %v3178_v6 = vld [vmem:[#allocation2 + $0x38] sm:$0xff]   ;;  %v3179_v7 = vld [vmem:[#allocation2 + $0x70] sm:$0xff]   ;;  %vm1421_vm3 = vcmask 1041408  }
  0x3e   :  { %v94_v2 = vld [vmem:[%s4173_s0] sm:$0x3]  ;;  %v109_v3 = vsel %vm107_vm1, %v3176_v1, 0  ;;  %2673 = vmatprep.subr.bf16.mxu1 %v3177_v5  ;;  %v3180_v8 = vld [vmem:[#allocation2 + $0x30] sm:$0xff]   ;;  %v3181_v9 = vld [vmem:[#allocation2 + $0x68] sm:$0xff]  }
  0x3f   :  { %v95_v4 = vpack.c.bf16 %v94_v2, %v94_v2  ;;  %2840 = vmatpush3.bf16.msra.mxu0 %v109_v3  ;;  %2674 = vmatpush3.bf16.msra.mxu1 %v3178_v6  ;;  %v3182_v10 = vld [vmem:[#allocation2 + $0x28] sm:$0xff]   ;;  %v3183_v11 = vld [vmem:[#allocation2 + $0x60] sm:$0xff]   ;;  %v3185_v13 = vld [vmem:[#allocation2 + $0x58] sm:$0xff]  }
  0x40   :  { %2675 = vmatprep.subr.bf16.mxu1 %v3179_v7  ;;  %v3184_v12 = vld [vmem:[#allocation2 + $0x20] sm:$0xff]   ;;  %v3186_v14 = vld [vmem:[#allocation2 + $0x18] sm:$0xff]   ;;  %v3187_v15 = vld [vmem:[#allocation2 + $0x50] sm:$0xff]  }
  0x41   :  { %v3188_v16 = vld [vmem:[#allocation2 + $0x10] sm:$0xff]   ;;  %v3189_v17 = vld [vmem:[#allocation2 + $0x48] sm:$0xff]   ;;  %v3191_v19 = vld [vmem:[#allocation2 + $0x40] sm:$0xff]  }
  0x42   :  { %2842 = vmatmul.mubr.msk.bf16.vlgmr.msra.gmra.mxu0 %vm103_vm2, %v95_v4  ;;  %v3190_v18 = vld [vmem:[#allocation2 + $0x8] sm:$0xff]   ;;  %v152_v20 = vld [vmem:[%s4174_s1] sm:$0x3] }
  0x43   :  { %2676 = vmatpush3.bf16.msra.mxu1 %v3180_v8  ;;  %v154_v21 = vpack.c.bf16 %v152_v20, %v152_v20  ;;  %v3192_v22 = vld [vmem:[#allocation2] sm:$0xff]   ;;  %v438_v25 = vld [vmem:[#allocation4 + $0x388] sm:$0xff] }
  0x44   :  { %2677 = vmatprep.subr.bf16.mxu1 %v3181_v9  ;;  %v437_v23 = vld [vmem:[#allocation4 + $0x380] sm:$0xff]  ;;  %v446_v28 = vld [vmem:[#allocation4 + $0x3c8] sm:$0xff] }
  0x45   :  { %315 = vmatprep.mubr.bf16.mxu1 %v154_v21  ;;  %v445_v24 = vld [vmem:[#allocation4 + $0x3c0] sm:$0xff]  ;;  %v2649_v31 = vcombine.low %v438_v25, %v446_v28  ;;  %v2650_v32 = vcombine.high %v438_v25, %v446_v28  ;;  %v422_v43 = vld [vmem:[#allocation4 + $0x308] sm:$0xff] }
  0x46   :  { %v2647_v26 = vcombine.low %v437_v23, %v445_v24  ;;  %v2648_v27 = vcombine.high %v437_v23, %v445_v24  ;;  %v421_v29 = vld [vmem:[#allocation4 + $0x300] sm:$0xff]  ;;  %v430_v44 = vld [vmem:[#allocation4 + $0x348] sm:$0xff] }
  0x47   :  { %2678 = vmatpush3.bf16.msra.mxu1 %v3182_v10  ;;  %v429_v30 = vld [vmem:[#allocation4 + $0x340] sm:$0xff]  ;;  %v2634_v47 = vcombine.high %v422_v43, %v430_v44  ;;  %v406_v48 = vld [vmem:[#allocation4 + $0x288] sm:$0xff]  ;;  %v2633_v50 = vcombine.low %v422_v43, %v430_v44  ;;  %v423_v44 = vld [vmem:[#allocation4 + $0x310] sm:$0xff] }
  0x48   :  { %2679 = vmatprep.subr.bf16.mxu1 %v3183_v11  ;;  %v2632_v33 = vcombine.high %v421_v29, %v429_v30  ;;  %1093 = vmatprep.subr.bf16.mxu0 %v2648_v27  ;;  %v2631_v34 = vcombine.low %v421_v29, %v429_v30  ;;  %v405_v35 = vld [vmem:[#allocation4 + $0x280] sm:$0xff]  ;;  %v414_v49 = vld [vmem:[#allocation4 + $0x2c8] sm:$0xff]  ;;  %v439_v30 = vld [vmem:[#allocation4 + $0x390] sm:$0xff] }
  0x49   :  { %1094 = vmatpush1.bf16.msra.mxu0 %v2647_v26  ;;  %v413_v36 = vld [vmem:[#allocation4 + $0x2c0] sm:$0xff]  ;;  %v2618_v51 = vcombine.high %v406_v48, %v414_v49  ;;  %v2617_v52 = vcombine.low %v406_v48, %v414_v49  ;;  %v390_v55 = vld [vmem:[#allocation4 + $0x208] sm:$0xff] }
  0x4a   :  { %1095 = vmatprep.subr.bf16.mxu0 %v2632_v33  ;;  %v2616_v37 = vcombine.high %v405_v35, %v413_v36  ;;  %v2615_v38 = vcombine.low %v405_v35, %v413_v36  ;;  %v389_v53 = vld [vmem:[#allocation4 + $0x200] sm:$0xff]  ;;  %v398_v57 = vld [vmem:[#allocation4 + $0x248] sm:$0xff] }
  0x4b   :  { %2680 = vmatpush3.bf16.msra.mxu1 %v3184_v12  ;;  %v397_v54 = vld [vmem:[#allocation4 + $0x240] sm:$0xff]  ;;  %v2601_v59 = vcombine.low %v390_v55, %v398_v57  ;;  %v2602_v60 = vcombine.high %v390_v55, %v398_v57  ;;  %v374_v63 = vld [vmem:[#allocation4 + $0x188] sm:$0xff]  ;;  %v416_v55 = vld [vmem:[#allocation4 + $0x2d8] sm:$0xff] }
  0x4c   :  { %2681 = vmatprep.subr.bf16.mxu1 %v3185_v13  ;;  %v2600_v56 = vcombine.high %v389_v53, %v397_v54  ;;  %v2599_v58 = vcombine.low %v389_v53, %v397_v54  ;;  %v373_v61 = vld [vmem:[#allocation4 + $0x180] sm:$0xff]  ;;  %v382_v2 = vld [vmem:[#allocation4 + $0x1c8] sm:$0xff]  ;;  %v415_v53 = vld [vmem:[#allocation4 + $0x2d0] sm:$0xff] }
  0x4d   :  { %1096 = vmatpush1.bf16.msra.mxu0 %v2631_v34  ;;  %v381_v62 = vld [vmem:[#allocation4 + $0x1c0] sm:$0xff]  ;;  %v2585_v4 = vcombine.low %v374_v63, %v382_v2  ;;  %v2586_v5 = vcombine.high %v374_v63, %v382_v2  ;;  %v358_v8 = vld [vmem:[#allocation4 + $0x108] sm:$0xff]  ;;  %v448_v34 = vld [vmem:[#allocation4 + $0x3d8] sm:$0xff] }
  0x4e   :  { %1097 = vmatprep.subr.bf16.mxu0 %v2616_v37  ;;  %v2584_v1 = vcombine.high %v373_v61, %v381_v62  ;;  %v2583_v3 = vcombine.low %v373_v61, %v381_v62  ;;  %v357_v6 = vld [vmem:[#allocation4 + $0x100] sm:$0xff]  ;;  %v366_v10 = vld [vmem:[#allocation4 + $0x148] sm:$0xff]  ;;  %v408_v54 = vld [vmem:[#allocation4 + $0x298] sm:$0xff] }
  0x4f   :  { %2682 = vmatpush3.bf16.msra.mxu1 %v3186_v14  ;;  %v365_v7 = vld [vmem:[#allocation4 + $0x140] sm:$0xff]  ;;  %v2569_v12 = vcombine.low %v358_v8, %v366_v10  ;;  %v2570_v13 = vcombine.high %v358_v8, %v366_v10  ;;  %v326_v24 = vld [vmem:[#allocation4 + $0x8] sm:$0xff]  ;;  %v399_v61 = vld [vmem:[#allocation4 + $0x250] sm:$0xff]  ;;  %v2621_v2 = vcombine.low %v408_v54, %v416_v55 }
  0x50   :  { %2683 = vmatprep.subr.bf16.mxu1 %v3187_v15  ;;  %v2568_v9 = vcombine.high %v357_v6, %v365_v7  ;;  %v2567_v11 = vcombine.low %v357_v6, %v365_v7  ;;  %v341_v14 = vld [vmem:[#allocation4 + $0x80] sm:$0xff]  ;;  %v334_v26 = vld [vmem:[#allocation4 + $0x48] sm:$0xff]  ;;  %v392_v62 = vld [vmem:[#allocation4 + $0x218] sm:$0xff] }
  0x51   :  { %1098 = vmatpush1.bf16.msra.mxu0 %v2615_v38  ;;  %v349_v15 = vld [vmem:[#allocation4 + $0xc0] sm:$0xff]  ;;  %v2537_v28 = vcombine.low %v326_v24, %v334_v26  ;;  %v2538_v29 = vcombine.high %v326_v24, %v334_v26  ;;  %v3387_v38 = vmov 0   ;;  %v400_v63 = vld [vmem:[#allocation4 + $0x258] sm:$0xff]  ;;  %v383_v6 = vld [vmem:[#allocation4 + $0x1d0] sm:$0xff] }
  0x52   :  { %1099 = vmatprep.subr.bf16.mxu0 %v2600_v56  ;;  %v333_v23 = vld [vmem:[#allocation4 + $0x40] sm:$0xff]  ;;  %1125 = vmatprep.mubr.bf16.mxu0 %v3387_v38  ;;  %v376_v7 = vld [vmem:[#allocation4 + $0x198] sm:$0xff]  ;;  %v2605_v10 = vcombine.low %v392_v62, %v400_v63 }
  0x53   :  { %2684 = vmatpush3.bf16.msra.mxu1 %v3188_v16  ;;  %v342_v16 = vld [vmem:[#allocation4 + $0x88] sm:$0xff]  ;;  %v384_v8 = vld [vmem:[#allocation4 + $0x1d8] sm:$0xff] }
  0x54   :  { %2685 = vmatprep.subr.bf16.mxu1 %v3189_v17  ;;  %v2552_v17 = vcombine.high %v341_v14, %v349_v15  ;;  %v352_v24 = vld [vmem:[#allocation4 + $0xd8] sm:$0xff] }
  0x55   :  { %1100 = vmatpush1.bf16.msra.mxu0 %v2599_v58 }
  0x56   :  { %1101 = vmatprep.subr.bf16.mxu0 %v2584_v1 }
  0x57   :  { %2686 = vmatpush3.bf16.msra.mxu1 %v3190_v18  ;;  %v350_v18 = vld [vmem:[#allocation4 + $0xc8] sm:$0xff] }
  0x58   :  { %2687 = vmatprep.subr.bf16.mxu1 %v3191_v19  ;;  %v2551_v19 = vcombine.low %v341_v14, %v349_v15  ;;  %v2553_v20 = vcombine.low %v342_v16, %v350_v18  ;;  %v2554_v21 = vcombine.high %v342_v16, %v350_v18  ;;  %v367_v14 = vld [vmem:[#allocation4 + $0x150] sm:$0xff]  ;;  %v360_v15 = vld [vmem:[#allocation4 + $0x118] sm:$0xff]  ;;  %v2589_v18 = vcombine.low %v376_v7, %v384_v8 }
  0x59   :  { %1102 = vmatpush1.bf16.msra.mxu0 %v2583_v3  ;;  %v368_v16 = vld [vmem:[#allocation4 + $0x158] sm:$0xff] }
  0x5a   :  { %1103 = vmatprep.subr.bf16.mxu0 %v2568_v9  ;;  %v2573_v26 = vcombine.low %v360_v15, %v368_v16 }
  0x5b   :  { %2688 = vmatpush3.bf16.msra.mxu1 %v3192_v22  ;;  %v325_v22 = vld [vmem:[#allocation4] sm:$0xff] }
  0x5c   :  { %1134 = vmatprep.subr.bf16.mxu1 %v2650_v32  ;;  %v2536_v25 = vcombine.high %v325_v22, %v333_v23  ;;  %v2535_v27 = vcombine.low %v325_v22, %v333_v23  ;;  %v440_v32 = vld [vmem:[#allocation4 + $0x398] sm:$0xff]  ;;  %v351_v22 = vld [vmem:[#allocation4 + $0xd0] sm:$0xff] }
  0x5d   :  { %1104 = vmatpush1.bf16.msra.mxu0 %v2567_v11  ;;  %v2653_v36 = vcombine.low %v440_v32, %v448_v34  ;;  %v2654_v37 = vcombine.high %v440_v32, %v448_v34  ;;  %v344_v23 = vld [vmem:[#allocation4 + $0x98] sm:$0xff] }
  0x5e   :  { %1105 = vmatprep.subr.bf16.mxu0 %v2552_v17  ;;  %v336_v32 = vld [vmem:[#allocation4 + $0x58] sm:$0xff]  ;;  %v2557_v34 = vcombine.low %v344_v23, %v352_v24 }
  0x61   :  { %1106 = vmatpush1.bf16.msra.mxu0 %v2551_v19 }
  0x62   :  { %1107 = vmatprep.subr.bf16.mxu0 %v2536_v25 }
  0x65   :  { %1108 = vmatpush1.bf16.msra.mxu0 %v2535_v27 }
 0x102   :  { %v145_v39 = vpop.f32.mrf.mxu0 }
 0x103   :  { %3201 = vtanh.f32 %v145_v39 }
 0x104   :  { %v2843_v40 = vpop.f32.mrf.mxu0 }
 0x106   :  { %v148_v41 = vpop.f32.mrf.mxu0 }
 0x108   :  { %v2844_v42 = vpop.f32.mrf.mxu0 }
 0x110   :  { %v3202_v45 = vpop.eup %3201 }
 0x111   :  { %v153_v46 = vpack.c.bf16 %v3202_v45, %v3202_v45  ;;  %v431_v45 = vld [vmem:[#allocation4 + $0x350] sm:$0xff] }
 0x112   :  { %v2635_v56 = vcombine.low %v423_v44, %v431_v45 }
 0x113   :  { %316 = vmatmul.mubr.bf16.vlgmr.msra.gmra.mxu1 %v153_v46  ;;  %v424_v46 = vld [vmem:[#allocation4 + $0x318] sm:$0xff] }
 0x114   :  { %1135 = vmatpush1.bf16.msra.mxu1 %v2649_v31  ;;  %v447_v31 = vld [vmem:[#allocation4 + $0x3d0] sm:$0xff]  ;;  %1166 = vmatprep.mubr.bf16.mxu1 %v3387_v38 }
 0x115   :  { %1136 = vmatprep.subr.bf16.mxu1 %v2634_v47  ;;  %v2652_v33 = vcombine.high %v439_v30, %v447_v31  ;;  %v2651_v35 = vcombine.low %v439_v30, %v447_v31  ;;  %v432_v47 = vld [vmem:[#allocation4 + $0x358] sm:$0xff]  ;;  %v335_v30 = vld [vmem:[#allocation4 + $0x50] sm:$0xff] }
 0x116   :  { %v2637_v57 = vcombine.low %v424_v46, %v432_v47  ;;  %v328_v31 = vld [vmem:[#allocation4 + $0x18] sm:$0xff] }
 0x117   :  { %1175 = vmatprep.subr.bf16.mxu0 %v2652_v33 }
 0x118   :  { %1137 = vmatpush1.bf16.msra.mxu1 %v2633_v50  ;;  %v2636_v50 = vcombine.high %v423_v44, %v431_v45 }
 0x119   :  { %1138 = vmatprep.subr.bf16.mxu1 %v2618_v51  ;;  %v2638_v51 = vcombine.high %v424_v46, %v432_v47  ;;  %v425_v46 = vld [vmem:[#allocation4 + $0x320] sm:$0xff] }
 0x11a   :  { %v433_v47 = vld [vmem:[#allocation4 + $0x360] sm:$0xff] }
 0x11c   :  { %1139 = vmatpush1.bf16.msra.mxu1 %v2617_v52  ;;  %v407_v52 = vld [vmem:[#allocation4 + $0x290] sm:$0xff] }
 0x11d   :  { %1140 = vmatprep.subr.bf16.mxu1 %v2602_v60  ;;  %v2620_v58 = vcombine.high %v407_v52, %v415_v53  ;;  %v391_v60 = vld [vmem:[#allocation4 + $0x210] sm:$0xff]  ;;  %v2619_v1 = vcombine.low %v407_v52, %v415_v53  ;;  %v2640_v53 = vcombine.high %v425_v46, %v433_v47 }
 0x11e   :  { %v2604_v3 = vcombine.high %v391_v60, %v399_v61  ;;  %v2603_v9 = vcombine.low %v391_v60, %v399_v61 }
 0x120   :  { %1141 = vmatpush1.bf16.msra.mxu1 %v2601_v59  ;;  %v2622_v59 = vcombine.high %v408_v54, %v416_v55  ;;  %v409_v55 = vld [vmem:[#allocation4 + $0x2a0] sm:$0xff] }
 0x121   :  { %1142 = vmatprep.subr.bf16.mxu1 %v2586_v5  ;;  %v375_v5 = vld [vmem:[#allocation4 + $0x190] sm:$0xff] }
 0x122   :  { %v2588_v11 = vcombine.high %v375_v5, %v383_v6  ;;  %v2587_v17 = vcombine.low %v375_v5, %v383_v6 }
 0x124   :  { %1143 = vmatpush1.bf16.msra.mxu1 %v2585_v4  ;;  %v2606_v4 = vcombine.high %v392_v62, %v400_v63  ;;  %v393_v63 = vld [vmem:[#allocation4 + $0x220] sm:$0xff] }
 0x125   :  { %1144 = vmatprep.subr.bf16.mxu1 %v2570_v13  ;;  %v359_v13 = vld [vmem:[#allocation4 + $0x110] sm:$0xff] }
 0x126   :  { %v2572_v19 = vcombine.high %v359_v13, %v367_v14  ;;  %v2571_v25 = vcombine.low %v359_v13, %v367_v14 }
 0x128   :  { %1145 = vmatpush1.bf16.msra.mxu1 %v2569_v12  ;;  %v2590_v12 = vcombine.high %v376_v7, %v384_v8  ;;  %v377_v8 = vld [vmem:[#allocation4 + $0x1a0] sm:$0xff] }
 0x129   :  { %1146 = vmatprep.subr.bf16.mxu1 %v2554_v21  ;;  %v343_v21 = vld [vmem:[#allocation4 + $0x90] sm:$0xff] }
 0x12a   :  { %v2556_v27 = vcombine.high %v343_v21, %v351_v22  ;;  %v2555_v33 = vcombine.low %v343_v21, %v351_v22 }
 0x12c   :  { %1147 = vmatpush1.bf16.msra.mxu1 %v2553_v20  ;;  %v2574_v20 = vcombine.high %v360_v15, %v368_v16  ;;  %v361_v16 = vld [vmem:[#allocation4 + $0x120] sm:$0xff] }
 0x12d   :  { %1148 = vmatprep.subr.bf16.mxu1 %v2538_v29  ;;  %v327_v29 = vld [vmem:[#allocation4 + $0x10] sm:$0xff] }
 0x130   :  { %1149 = vmatpush1.bf16.msra.mxu1 %v2537_v28  ;;  %v2558_v28 = vcombine.high %v344_v23, %v352_v24  ;;  %v345_v24 = vld [vmem:[#allocation4 + $0xa0] sm:$0xff] }
 0x131   :  { %1216 = vmatprep.subr.bf16.mxu1 %v2654_v37  ;;  %v441_v37 = vld [vmem:[#allocation4 + $0x3a0] sm:$0xff] }
 0x1d3   :  { %v2689_v39 = vpop.f32.mrf.mxu1 }
 0x1d5   :  { %v2690_v40 = vpop.f32.mrf.mxu1 }
 0x1d6   :  { %v2691_v41 = vadd.f32 %v2690_v40, %v2689_v39  ;;  %v449_v39 = vld [vmem:[#allocation4 + $0x3e0] sm:$0xff]  ;;  %v442_v40 = vld [vmem:[#allocation4 + $0x3a8] sm:$0xff] }
 0x1d7   :  { %v2692_v42 = vpop.f32.mrf.mxu1  ;;  %v2656_v44 = vcombine.high %v441_v37, %v449_v39 }
 0x1d8   :  { %3203 = vtanh.f32 %v2691_v41  ;;  %v450_v41 = vld [vmem:[#allocation4 + $0x3e8] sm:$0xff]  ;;  %v2539_v42 = vcombine.low %v327_v29, %v335_v30 }
 0x1d9   :  { %v2693_v43 = vpop.f32.mrf.mxu1  ;;  %v2658_v45 = vcombine.high %v442_v40, %v450_v41  ;;  %v2657_v52 = vcombine.low %v442_v40, %v450_v41  ;;  %v443_v41 = vld [vmem:[#allocation4 + $0x3b0] sm:$0xff] }
 0x1da   :  { %v2541_v43 = vcombine.low %v328_v31, %v336_v32 }
 0x1e5   :  { %v3204_v48 = vpop.eup %3203 }
 0x1e6   :  { %v3467_v49 = vpack.c.bf16 %v3204_v48, %v3204_v48  ;;  %v426_v48 = vld [vmem:[#allocation4 + $0x328] sm:$0xff] }
 0x1e8   :  { %1126 = vmatmul.mubr.bf16.vlgmr.msra.gmra.mxu0 %v3467_v49  ;;  %1167 = vmatmul.mubr.bf16.vlgmr.msra.gmra.mxu1 %v3467_v49 }
 0x1e9   :  { %1176 = vmatpush1.bf16.msra.mxu0 %v2651_v35  ;;  %1217 = vmatpush1.bf16.msra.mxu1 %v2653_v36  ;;  %v2540_v35 = vcombine.high %v327_v29, %v335_v30  ;;  %v2542_v36 = vcombine.high %v328_v31, %v336_v32  ;;  %v329_v32 = vld [vmem:[#allocation4 + $0x20] sm:$0xff] }
 0x1ea   :  { %1177 = vmatprep.subr.bf16.mxu0 %v2636_v50  ;;  %1218 = vmatprep.subr.bf16.mxu1 %v2638_v51  ;;  %v434_v50 = vld [vmem:[#allocation4 + $0x368] sm:$0xff]  ;;  %v2655_v51 = vcombine.low %v441_v37, %v449_v39 }
 0x1eb   :  { %1207 = vmatprep.mubr.bf16.mxu0 %v3387_v38  ;;  %1248 = vmatprep.mubr.bf16.mxu1 %v3387_v38  ;;  %v2642_v54 = vcombine.high %v426_v48, %v434_v50  ;;  %v2641_v60 = vcombine.low %v426_v48, %v434_v50  ;;  %v427_v50 = vld [vmem:[#allocation4 + $0x330] sm:$0xff] }
 0x1ed   :  { %1178 = vmatpush1.bf16.msra.mxu0 %v2635_v56  ;;  %1219 = vmatpush1.bf16.msra.mxu1 %v2637_v57  ;;  %v417_v56 = vld [vmem:[#allocation4 + $0x2e0] sm:$0xff]  ;;  %v410_v57 = vld [vmem:[#allocation4 + $0x2a8] sm:$0xff] }
 0x1ee   :  { %1179 = vmatprep.subr.bf16.mxu0 %v2620_v58  ;;  %1220 = vmatprep.subr.bf16.mxu1 %v2622_v59  ;;  %v418_v58 = vld [vmem:[#allocation4 + $0x2e8] sm:$0xff]  ;;  %v2639_v59 = vcombine.low %v425_v46, %v433_v47  ;;  %v2624_v61 = vcombine.high %v409_v55, %v417_v56 }
 0x1ef   :  { %v2626_v62 = vcombine.high %v410_v57, %v418_v58  ;;  %v2625_v5 = vcombine.low %v410_v57, %v418_v58  ;;  %v411_v58 = vld [vmem:[#allocation4 + $0x2b0] sm:$0xff] }
 0x1f1   :  { %1180 = vmatpush1.bf16.msra.mxu0 %v2619_v1  ;;  %1221 = vmatpush1.bf16.msra.mxu1 %v2621_v2  ;;  %v401_v1 = vld [vmem:[#allocation4 + $0x260] sm:$0xff]  ;;  %v394_v2 = vld [vmem:[#allocation4 + $0x228] sm:$0xff] }
 0x1f2   :  { %1181 = vmatprep.subr.bf16.mxu0 %v2604_v3  ;;  %1222 = vmatprep.subr.bf16.mxu1 %v2606_v4  ;;  %v402_v3 = vld [vmem:[#allocation4 + $0x268] sm:$0xff]  ;;  %v2623_v4 = vcombine.low %v409_v55, %v417_v56  ;;  %v2608_v6 = vcombine.high %v393_v63, %v401_v1 }
 0x1f3   :  { %v2610_v7 = vcombine.high %v394_v2, %v402_v3  ;;  %v2609_v13 = vcombine.low %v394_v2, %v402_v3  ;;  %v395_v3 = vld [vmem:[#allocation4 + $0x230] sm:$0xff] }
 0x1f5   :  { %1182 = vmatpush1.bf16.msra.mxu0 %v2603_v9  ;;  %1223 = vmatpush1.bf16.msra.mxu1 %v2605_v10  ;;  %v385_v9 = vld [vmem:[#allocation4 + $0x1e0] sm:$0xff]  ;;  %v378_v10 = vld [vmem:[#allocation4 + $0x1a8] sm:$0xff] }
 0x1f6   :  { %1183 = vmatprep.subr.bf16.mxu0 %v2588_v11  ;;  %1224 = vmatprep.subr.bf16.mxu1 %v2590_v12  ;;  %v386_v11 = vld [vmem:[#allocation4 + $0x1e8] sm:$0xff]  ;;  %v2607_v12 = vcombine.low %v393_v63, %v401_v1  ;;  %v2592_v14 = vcombine.high %v377_v8, %v385_v9 }
 0x1f7   :  { %v2594_v15 = vcombine.high %v378_v10, %v386_v11  ;;  %v2593_v21 = vcombine.low %v378_v10, %v386_v11  ;;  %v379_v11 = vld [vmem:[#allocation4 + $0x1b0] sm:$0xff] }
 0x1f9   :  { %1184 = vmatpush1.bf16.msra.mxu0 %v2587_v17  ;;  %1225 = vmatpush1.bf16.msra.mxu1 %v2589_v18  ;;  %v369_v17 = vld [vmem:[#allocation4 + $0x160] sm:$0xff]  ;;  %v362_v18 = vld [vmem:[#allocation4 + $0x128] sm:$0xff] }
 0x1fa   :  { %1185 = vmatprep.subr.bf16.mxu0 %v2572_v19  ;;  %1226 = vmatprep.subr.bf16.mxu1 %v2574_v20  ;;  %v370_v19 = vld [vmem:[#allocation4 + $0x168] sm:$0xff]  ;;  %v2591_v20 = vcombine.low %v377_v8, %v385_v9  ;;  %v2576_v22 = vcombine.high %v361_v16, %v369_v17 }
 0x1fb   :  { %v2578_v23 = vcombine.high %v362_v18, %v370_v19  ;;  %v2577_v29 = vcombine.low %v362_v18, %v370_v19  ;;  %v363_v18 = vld [vmem:[#allocation4 + $0x130] sm:$0xff] }
 0x1fc   :  { %v371_v19 = vld [vmem:[#allocation4 + $0x170] sm:$0xff] }
 0x1fd   :  { %1186 = vmatpush1.bf16.msra.mxu0 %v2571_v25  ;;  %1227 = vmatpush1.bf16.msra.mxu1 %v2573_v26  ;;  %v353_v25 = vld [vmem:[#allocation4 + $0xe0] sm:$0xff]  ;;  %v346_v26 = vld [vmem:[#allocation4 + $0xa8] sm:$0xff] }
 0x1fe   :  { %1187 = vmatprep.subr.bf16.mxu0 %v2556_v27  ;;  %1228 = vmatprep.subr.bf16.mxu1 %v2558_v28  ;;  %v354_v27 = vld [vmem:[#allocation4 + $0xe8] sm:$0xff]  ;;  %v2575_v28 = vcombine.low %v361_v16, %v369_v17  ;;  %v2560_v30 = vcombine.high %v345_v24, %v353_v25 }
 0x1ff   :  { %v2562_v31 = vcombine.high %v346_v26, %v354_v27  ;;  %v2561_v37 = vcombine.low %v346_v26, %v354_v27  ;;  %v347_v26 = vld [vmem:[#allocation4 + $0xb0] sm:$0xff] }
 0x200   :  { %v355_v27 = vld [vmem:[#allocation4 + $0xf0] sm:$0xff] }
 0x201   :  { %1188 = vmatpush1.bf16.msra.mxu0 %v2555_v33  ;;  %1229 = vmatpush1.bf16.msra.mxu1 %v2557_v34  ;;  %v337_v33 = vld [vmem:[#allocation4 + $0x60] sm:$0xff]  ;;  %v330_v34 = vld [vmem:[#allocation4 + $0x28] sm:$0xff] }
 0x202   :  { %1189 = vmatprep.subr.bf16.mxu0 %v2540_v35  ;;  %1230 = vmatprep.subr.bf16.mxu1 %v2542_v36  ;;  %v338_v35 = vld [vmem:[#allocation4 + $0x68] sm:$0xff]  ;;  %v2559_v36 = vcombine.low %v345_v24, %v353_v25  ;;  %v2544_v39 = vcombine.high %v329_v32, %v337_v33  ;;  %v2580_v24 = vcombine.high %v363_v18, %v371_v19 }
 0x203   :  { %v2546_v40 = vcombine.high %v330_v34, %v338_v35  ;;  %v2545_v46 = vcombine.low %v330_v34, %v338_v35  ;;  %v331_v34 = vld [vmem:[#allocation4 + $0x30] sm:$0xff] }
 0x204   :  { %v339_v35 = vld [vmem:[#allocation4 + $0x70] sm:$0xff] }
 0x205   :  { %1190 = vmatpush1.bf16.msra.mxu0 %v2539_v42  ;;  %1231 = vmatpush1.bf16.msra.mxu1 %v2541_v43  ;;  %v451_v42 = vld [vmem:[#allocation4 + $0x3f0] sm:$0xff]  ;;  %v444_v43 = vld [vmem:[#allocation4 + $0x3b8] sm:$0xff] }
 0x206   :  { %1257 = vmatprep.subr.bf16.mxu0 %v2656_v44  ;;  %1298 = vmatprep.subr.bf16.mxu1 %v2658_v45  ;;  %v452_v44 = vld [vmem:[#allocation4 + $0x3f8] sm:$0xff]  ;;  %v2543_v45 = vcombine.low %v329_v32, %v337_v33  ;;  %v2660_v47 = vcombine.high %v443_v41, %v451_v42  ;;  %v2564_v32 = vcombine.high %v347_v26, %v355_v27 }
 0x207   :  { %v2662_v48 = vcombine.high %v444_v43, %v452_v44  ;;  %v2661_v55 = vcombine.low %v444_v43, %v452_v44  ;;  %v2547_v43 = vcombine.low %v331_v34, %v339_v35 }
 0x208   :  { %1208 = vmatmul.mubr.bf16.vlgmr.msra.gmra.mxu0 %v3467_v49  ;;  %1249 = vmatmul.mubr.bf16.vlgmr.msra.gmra.mxu1 %v3467_v49 }
 0x209   :  { %1258 = vmatpush1.bf16.msra.mxu0 %v2655_v51  ;;  %1299 = vmatpush1.bf16.msra.mxu1 %v2657_v52  ;;  %v435_v51 = vld [vmem:[#allocation4 + $0x370] sm:$0xff]  ;;  %v428_v52 = vld [vmem:[#allocation4 + $0x338] sm:$0xff] }
 0x20a   :  { %1259 = vmatprep.subr.bf16.mxu0 %v2640_v53  ;;  %1300 = vmatprep.subr.bf16.mxu1 %v2642_v54  ;;  %v436_v53 = vld [vmem:[#allocation4 + $0x378] sm:$0xff]  ;;  %v2659_v54 = vcombine.low %v443_v41, %v451_v42  ;;  %v2644_v56 = vcombine.high %v427_v50, %v435_v51  ;;  %v2548_v41 = vcombine.high %v331_v34, %v339_v35 }
 0x20b   :  { %1289 = vmatprep.mubr.bf16.mxu0 %v3387_v38  ;;  %1330 = vmatprep.mubr.bf16.mxu1 %v3387_v38  ;;  %v2646_v57 = vcombine.high %v428_v52, %v436_v53  ;;  %v2645_v63 = vcombine.low %v428_v52, %v436_v53 }
 0x20d   :  { %1260 = vmatpush1.bf16.msra.mxu0 %v2639_v59  ;;  %1301 = vmatpush1.bf16.msra.mxu1 %v2641_v60  ;;  %v419_v59 = vld [vmem:[#allocation4 + $0x2f0] sm:$0xff]  ;;  %v412_v60 = vld [vmem:[#allocation4 + $0x2b8] sm:$0xff] }
 0x20e   :  { %1261 = vmatprep.subr.bf16.mxu0 %v2624_v61  ;;  %1302 = vmatprep.subr.bf16.mxu1 %v2626_v62  ;;  %v420_v61 = vld [vmem:[#allocation4 + $0x2f8] sm:$0xff]  ;;  %v2643_v62 = vcombine.low %v427_v50, %v435_v51  ;;  %v2628_v1 = vcombine.high %v411_v58, %v419_v59 }
 0x20f   :  { %v2630_v2 = vcombine.high %v412_v60, %v420_v61  ;;  %v2629_v8 = vcombine.low %v412_v60, %v420_v61 }
 0x211   :  { %1262 = vmatpush1.bf16.msra.mxu0 %v2623_v4  ;;  %1303 = vmatpush1.bf16.msra.mxu1 %v2625_v5  ;;  %v403_v4 = vld [vmem:[#allocation4 + $0x270] sm:$0xff]  ;;  %v396_v5 = vld [vmem:[#allocation4 + $0x238] sm:$0xff] }
 0x212   :  { %1263 = vmatprep.subr.bf16.mxu0 %v2608_v6  ;;  %1304 = vmatprep.subr.bf16.mxu1 %v2610_v7  ;;  %v404_v6 = vld [vmem:[#allocation4 + $0x278] sm:$0xff]  ;;  %v2627_v7 = vcombine.low %v411_v58, %v419_v59  ;;  %v2612_v9 = vcombine.high %v395_v3, %v403_v4 }
 0x213   :  { %v2614_v10 = vcombine.high %v396_v5, %v404_v6  ;;  %v2613_v16 = vcombine.low %v396_v5, %v404_v6 }
 0x215   :  { %1264 = vmatpush1.bf16.msra.mxu0 %v2607_v12  ;;  %1305 = vmatpush1.bf16.msra.mxu1 %v2609_v13  ;;  %v387_v12 = vld [vmem:[#allocation4 + $0x1f0] sm:$0xff]  ;;  %v380_v13 = vld [vmem:[#allocation4 + $0x1b8] sm:$0xff] }
 0x216   :  { %1265 = vmatprep.subr.bf16.mxu0 %v2592_v14  ;;  %1306 = vmatprep.subr.bf16.mxu1 %v2594_v15  ;;  %v388_v14 = vld [vmem:[#allocation4 + $0x1f8] sm:$0xff]  ;;  %v2611_v15 = vcombine.low %v395_v3, %v403_v4  ;;  %v2596_v17 = vcombine.high %v379_v11, %v387_v12 }
 0x219   :  { %1266 = vmatpush1.bf16.msra.mxu0 %v2591_v20  ;;  %1307 = vmatpush1.bf16.msra.mxu1 %v2593_v21  ;;  %v364_v20 = vld [vmem:[#allocation4 + $0x138] sm:$0xff] }
 0x21a   :  { %1267 = vmatprep.subr.bf16.mxu0 %v2576_v22  ;;  %1308 = vmatprep.subr.bf16.mxu1 %v2578_v23  ;;  %v372_v21 = vld [vmem:[#allocation4 + $0x178] sm:$0xff]  ;;  %v2595_v22 = vcombine.low %v379_v11, %v387_v12  ;;  %v2597_v23 = vcombine.low %v380_v13, %v388_v14 }
 0x21b   :  { %v2582_v25 = vcombine.high %v364_v20, %v372_v21 }
 0x21d   :  { %1268 = vmatpush1.bf16.msra.mxu0 %v2575_v28  ;;  %1309 = vmatpush1.bf16.msra.mxu1 %v2577_v29  ;;  %v348_v28 = vld [vmem:[#allocation4 + $0xb8] sm:$0xff] }
 0x21e   :  { %1269 = vmatprep.subr.bf16.mxu0 %v2560_v30  ;;  %1310 = vmatprep.subr.bf16.mxu1 %v2562_v31  ;;  %v356_v29 = vld [vmem:[#allocation4 + $0xf8] sm:$0xff]  ;;  %v2579_v30 = vcombine.low %v363_v18, %v371_v19  ;;  %v2581_v31 = vcombine.low %v364_v20, %v372_v21 }
 0x21f   :  { %v2566_v33 = vcombine.high %v348_v28, %v356_v29 }
 0x221   :  { %1270 = vmatpush1.bf16.msra.mxu0 %v2559_v36  ;;  %1311 = vmatpush1.bf16.msra.mxu1 %v2561_v37  ;;  %v332_v36 = vld [vmem:[#allocation4 + $0x38] sm:$0xff] }
 0x222   :  { %1271 = vmatprep.subr.bf16.mxu0 %v2544_v39  ;;  %1312 = vmatprep.subr.bf16.mxu1 %v2546_v40  ;;  %v340_v37 = vld [vmem:[#allocation4 + $0x78] sm:$0xff]  ;;  %v2563_v39 = vcombine.low %v347_v26, %v355_v27  ;;  %v2565_v40 = vcombine.low %v348_v28, %v356_v29 }
 0x223   :  { %v2550_v42 = vcombine.high %v332_v36, %v340_v37  ;;  %v2549_v44 = vcombine.low %v332_v36, %v340_v37 }
 0x225   :  { %1272 = vmatpush1.bf16.msra.mxu0 %v2543_v45  ;;  %1313 = vmatpush1.bf16.msra.mxu1 %v2545_v46 }
 0x226   :  { %1339 = vmatprep.subr.bf16.mxu0 %v2660_v47  ;;  %1380 = vmatprep.subr.bf16.mxu1 %v2662_v48 }
 0x228   :  { %1290 = vmatmul.mubr.bf16.vlgmr.msra.gmra.mxu0 %v3467_v49  ;;  %1331 = vmatmul.mubr.bf16.vlgmr.msra.gmra.mxu1 %v3467_v49 }
 0x229   :  { %1340 = vmatpush1.bf16.msra.mxu0 %v2659_v54  ;;  %1381 = vmatpush1.bf16.msra.mxu1 %v2661_v55 }
 0x22a   :  { %1341 = vmatprep.subr.bf16.mxu0 %v2644_v56  ;;  %1382 = vmatprep.subr.bf16.mxu1 %v2646_v57 }
 0x22b   :  { %1371 = vmatprep.mubr.bf16.mxu0 %v3387_v38  ;;  %1412 = vmatprep.mubr.bf16.mxu1 %v3387_v38  ;;  %v2598_v38 = vcombine.high %v380_v13, %v388_v14 }
 0x22d   :  { %1342 = vmatpush1.bf16.msra.mxu0 %v2643_v62  ;;  %1383 = vmatpush1.bf16.msra.mxu1 %v2645_v63 }
 0x22e   :  { %1343 = vmatprep.subr.bf16.mxu0 %v2628_v1  ;;  %1384 = vmatprep.subr.bf16.mxu1 %v2630_v2 }
 0x231   :  { %1344 = vmatpush1.bf16.msra.mxu0 %v2627_v7  ;;  %1385 = vmatpush1.bf16.msra.mxu1 %v2629_v8 }
 0x232   :  { %1345 = vmatprep.subr.bf16.mxu0 %v2612_v9  ;;  %1386 = vmatprep.subr.bf16.mxu1 %v2614_v10 }
 0x235   :  { %1346 = vmatpush1.bf16.msra.mxu0 %v2611_v15  ;;  %1387 = vmatpush1.bf16.msra.mxu1 %v2613_v16 }
 0x236   :  { %1347 = vmatprep.subr.bf16.mxu0 %v2596_v17  ;;  %1388 = vmatprep.subr.bf16.mxu1 %v2598_v38 }
 0x239   :  { %1348 = vmatpush1.bf16.msra.mxu0 %v2595_v22  ;;  %1389 = vmatpush1.bf16.msra.mxu1 %v2597_v23 }
 0x23a   :  { %1349 = vmatprep.subr.bf16.mxu0 %v2580_v24  ;;  %1390 = vmatprep.subr.bf16.mxu1 %v2582_v25 }
 0x23d   :  { %1350 = vmatpush1.bf16.msra.mxu0 %v2579_v30  ;;  %1391 = vmatpush1.bf16.msra.mxu1 %v2581_v31 }
 0x23e   :  { %1351 = vmatprep.subr.bf16.mxu0 %v2564_v32  ;;  %1392 = vmatprep.subr.bf16.mxu1 %v2566_v33 }
 0x241   :  { %1352 = vmatpush1.bf16.msra.mxu0 %v2563_v39  ;;  %1393 = vmatpush1.bf16.msra.mxu1 %v2565_v40 }
 0x242   :  { %1353 = vmatprep.subr.bf16.mxu0 %v2548_v41  ;;  %1394 = vmatprep.subr.bf16.mxu1 %v2550_v42 }
 0x245   :  { %1354 = vmatpush1.bf16.msra.mxu0 %v2547_v43  ;;  %1395 = vmatpush1.bf16.msra.mxu1 %v2549_v44 }
 0x246   :  { %2845 = vmatprep.subr.bf16.mxu0 %v4182_v0  ;;  %2865 = vmatprep.subr.bf16.mxu1 %v4182_v0 }
 0x248   :  { %1372 = vmatmul.mubr.bf16.vlgmr.msra.gmra.mxu0 %v3467_v49  ;;  %1413 = vmatmul.mubr.bf16.vlgmr.msra.gmra.mxu1 %v3467_v49 }
 0x249   :  { %2861 = vmatprep.mubr.msk.bf16.mxu0 %vm3386_vm0, %v4182_v0  ;;  %2881 = vmatprep.mubr.msk.bf16.mxu1 %vm3386_vm0, %v4182_v0 }
 0x2a8   :  { %v3489_v45 = vpop.f32.mrf.mxu0  ;;  %v3491_v46 = vpop.f32.mrf.mxu1 }
 0x2a9   :  { %v1455_v62 = vmul.f32 %v3489_v45, %v3489_v45  ;;  %v1422_v1 = vsel %vm1421_vm3, %v3489_v45, 0.0  ;;  %v1457_v5 = vmul.f32 %v3491_v46, %v3491_v46  ;;  %v1425_v7 = vsel %vm1421_vm3, %v3491_v46, 0.0 }
 0x2aa   :  { %v3493_v47 = vpop.f32.mrf.mxu0  ;;  %v3495_v48 = vpop.f32.mrf.mxu1 }
 0x2ab   :  { %v1456_v61 = vmul.f32 %v3493_v47, %v3493_v47  ;;  %v1423_v63 = vsel %vm1421_vm3, %v3493_v47, 0.0  ;;  %v1471_v4 = vsel %vm1421_vm3, %v1455_v62, 0.0  ;;  %v1474_v11 = vsel %vm1421_vm3, %v1457_v5, 0.0 }
 0x2ac   :  { %v1131_v50 = vpop.f32.mrf.mxu0  ;;  %v1172_v51 = vpop.f32.mrf.mxu1  ;;  %v1424_v3 = vadd.f32 %v1423_v63, %v1422_v1  ;;  %v1458_v12 = vmul.f32 %v3495_v48, %v3495_v48  ;;  %v1427_v17 = vsel %vm1421_vm3, %v3495_v48, 0.0 }
 0x2ad   :  { %v1472_v2 = vsel %vm1421_vm3, %v1456_v61, 0.0 }
 0x2ae   :  { %v1132_v52 = vpop.f32.mrf.mxu0  ;;  %v1173_v53 = vpop.f32.mrf.mxu1  ;;  %v1473_v6 = vadd.f32 %v1472_v2, %v1471_v4  ;;  %v1426_v8 = vadd.f32 %v1425_v7, %v1424_v3  ;;  %v1476_v21 = vsel %vm1421_vm3, %v1458_v12, 0.0 }
 0x2b0   :  { %v1475_v14 = vadd.f32 %v1474_v11, %v1473_v6  ;;  %v1428_v18 = vadd.f32 %v1427_v17, %v1426_v8 }
 0x2b2   :  { %v1477_v24 = vadd.f32 %v1476_v21, %v1475_v14 }
 0x2c8   :  { %v3497_v54 = vpop.f32.mrf.mxu0  ;;  %v3499_v49 = vpop.f32.mrf.mxu1 }
 0x2c9   :  { %v1459_v13 = vmul.f32 %v3497_v54, %v3497_v54  ;;  %v1429_v38 = vsel %vm1421_vm3, %v3497_v54, 0.0  ;;  %v1461_v32 = vmul.f32 %v3499_v49, %v3499_v49  ;;  %v1433_v34 = vsel %vm1421_vm3, %v3499_v49, 0.0 }
 0x2ca   :  { %v3501_v55 = vpop.f32.mrf.mxu0  ;;  %v3503_v56 = vpop.f32.mrf.mxu1  ;;  %v1430_v25 = vadd.f32 %v1429_v38, %v1428_v18 }
 0x2cb   :  { %v1478_v22 = vsel %vm1421_vm3, %v1459_v13, 0.0  ;;  %v1460_v23 = vmul.f32 %v3501_v55, %v3501_v55  ;;  %v1431_v28 = vsel %vm1421_vm3, %v3501_v55, 0.0  ;;  %v1482_v36 = vsel %vm1421_vm3, %v1461_v32, 0.0 }
 0x2cc   :  { %v1213_v57 = vpop.f32.mrf.mxu0  ;;  %v1254_v58 = vpop.f32.mrf.mxu1  ;;  %v1479_v29 = vadd.f32 %v1478_v22, %v1477_v24  ;;  %v1432_v31 = vadd.f32 %v1431_v28, %v1430_v25  ;;  %v1462_v37 = vmul.f32 %v3503_v56, %v3503_v56  ;;  %v1435_v41 = vsel %vm1421_vm3, %v3503_v56, 0.0 }
 0x2cd   :  { %v1480_v30 = vsel %vm1421_vm3, %v1460_v23, 0.0 }
 0x2ce   :  { %v1214_v59 = vpop.f32.mrf.mxu0  ;;  %v1255_v60 = vpop.f32.mrf.mxu1  ;;  %v1481_v33 = vadd.f32 %v1480_v30, %v1479_v29  ;;  %v1434_v35 = vadd.f32 %v1433_v34, %v1432_v31  ;;  %v1484_v44 = vsel %vm1421_vm3, %v1462_v37, 0.0 }
 0x2d0   :  { %v1483_v40 = vadd.f32 %v1482_v36, %v1481_v33  ;;  %v1436_v43 = vadd.f32 %v1435_v41, %v1434_v35  ;;  %v3601_v41 = vld [vmem:[#allocation9 + $0x38] sm:$0xff]  }
 0x2d1   :  { %2846 = vmatpush3.bf16.msra.mxu0 %v3601_v41  ;;  %2866 = vmatpush3.bf16.msra.mxu1 %v3601_v41 }
 0x2d2   :  { %v1485_v52 = vadd.f32 %v1484_v44, %v1483_v40  ;;  %2847 = vmatprep.subr.bf16.mxu0 %v4182_v0  ;;  %2867 = vmatprep.subr.bf16.mxu1 %v4182_v0  ;;  %v1546_v44 = vlaneseq }
 0x2e8   :  { %v3519_v9 = vpop.f32.mrf.mxu0  ;;  %v3521_v10 = vpop.f32.mrf.mxu1 }
 0x2e9   :  { %v1463_v39 = vmul.f32 %v3519_v9, %v3519_v9  ;;  %v1437_v42 = vsel %vm1421_vm3, %v3519_v9, 0.0  ;;  %v1465_v61 = vmul.f32 %v3521_v10, %v3521_v10  ;;  %v1441_v63 = vsel %vm1421_vm3, %v3521_v10, 0.0 }
 0x2ea   :  { %v3528_v15 = vpop.f32.mrf.mxu0  ;;  %v3530_v16 = vpop.f32.mrf.mxu1  ;;  %v1438_v53 = vadd.f32 %v1437_v42, %v1436_v43  ;;  %v3605_v42 = vld [vmem:[#allocation9 + $0x30] sm:$0xff]   ;;  %v3611_v43 = vld [vmem:[#allocation9 + $0x28] sm:$0xff]  }
 0x2eb   :  { %v1486_v50 = vsel %vm1421_vm3, %v1463_v39, 0.0  ;;  %v1464_v51 = vmul.f32 %v3528_v15, %v3528_v15  ;;  %v1439_v57 = vsel %vm1421_vm3, %v3528_v15, 0.0  ;;  %v1490_v2 = vsel %vm1421_vm3, %v1465_v61, 0.0  ;;  %2848 = vmatpush3.bf16.msra.mxu0 %v3605_v42  ;;  %2868 = vmatpush3.bf16.msra.mxu1 %v3605_v42 }
 0x2ec   :  { %v1295_v19 = vpop.f32.mrf.mxu0  ;;  %v1336_v20 = vpop.f32.mrf.mxu1  ;;  %v1487_v58 = vadd.f32 %v1486_v50, %v1485_v52  ;;  %v1440_v60 = vadd.f32 %v1439_v57, %v1438_v53  ;;  %v1466_v3 = vmul.f32 %v3530_v16, %v3530_v16  ;;  %v1443_v5 = vsel %vm1421_vm3, %v3530_v16, 0.0  ;;  %2849 = vmatprep.subr.bf16.mxu0 %v4182_v0  ;;  %2869 = vmatprep.subr.bf16.mxu1 %v4182_v0  ;;  %v3617_v50 = vld [vmem:[#allocation9 + $0x20] sm:$0xff]   ;;  %v3623_v52 = vld [vmem:[#allocation9 + $0x18] sm:$0xff]  }
 0x2ed   :  { %v1488_v59 = vsel %vm1421_vm3, %v1464_v51, 0.0  ;;  %v1547_v51 = vshrl.u32 %v1546_v44, 7  ;;  %v3625_v53 = vld [vmem:[#allocation6] sm:$0xff] }
 0x2ee   :  { %v1296_v26 = vpop.f32.mrf.mxu0  ;;  %v1337_v27 = vpop.f32.mrf.mxu1  ;;  %v1489_v62 = vadd.f32 %v1488_v59, %v1487_v58  ;;  %v1442_v1 = vadd.f32 %v1441_v63, %v1440_v60  ;;  %v1492_v11 = vsel %vm1421_vm3, %v1466_v3, 0.0  ;;  %v3631_v58 = vld [vmem:[#allocation7] sm:$0xff] }
 0x2ef   :  { %2850 = vmatpush3.bf16.msra.mxu0 %v3611_v43  ;;  %2870 = vmatpush3.bf16.msra.mxu1 %v3611_v43  ;;  %v3629_v57 = vsub.s32 4, %v1547_v51  ;;  %v3633_v59 = vsub.s32 5, %v1547_v51  ;;  %v3637_v61 = vsub.s32 6, %v1547_v51 }
 0x2f0   :  { %v1491_v4 = vadd.f32 %v1490_v2, %v1489_v62  ;;  %v1444_v6 = vadd.f32 %v1443_v5, %v1442_v1  ;;  %2851 = vmatprep.subr.bf16.mxu0 %v4182_v0  ;;  %2871 = vmatprep.subr.bf16.mxu1 %v4182_v0  ;;  %v3641_v62 = vld [vmem:[#allocation9 + $0x10] sm:$0xff]   ;;  %v3645_v1 = vsub.s32 7, %v1547_v51 }
 0x2f1   :  { %v1565_v60 = vrot.slane %v3625_v53, %v3629_v57  ;;  %v1569_v63 = vrot.slane %v3625_v53, %v3633_v59  ;;  %v1665_v2 = vrot.slane %v3631_v58, %v3629_v57  ;;  %v1573_v3 = vrot.slane %v3625_v53, %v3637_v61 }
 0x2f2   :  { %v1493_v14 = vadd.f32 %v1492_v11, %v1491_v4  ;;  %v1669_v4 = vrot.slane %v3631_v58, %v3633_v59  ;;  %v1577_v5 = vrot.slane %v3625_v53, %v3645_v1  ;;  %v3661_v11 = vld [vmem:[#allocation9 + $0x8] sm:$0xff]  }
 0x2f3   :  { %2852 = vmatpush3.bf16.msra.mxu0 %v3617_v50  ;;  %2872 = vmatpush3.bf16.msra.mxu1 %v3617_v50 }
 0x2f4   :  { %2853 = vmatprep.subr.bf16.mxu0 %v4182_v0  ;;  %2873 = vmatprep.subr.bf16.mxu1 %v4182_v0 }
 0x2f7   :  { %2854 = vmatpush3.bf16.msra.mxu0 %v3623_v52  ;;  %2874 = vmatpush3.bf16.msra.mxu1 %v3623_v52 }
 0x2f8   :  { %2855 = vmatprep.subr.bf16.mxu0 %v4182_v0  ;;  %2875 = vmatprep.subr.bf16.mxu1 %v4182_v0 }
 0x2fb   :  { %2856 = vmatpush3.bf16.msra.mxu0 %v3641_v62  ;;  %2876 = vmatpush3.bf16.msra.mxu1 %v3641_v62 }
 0x2fc   :  { %2857 = vmatprep.subr.bf16.mxu0 %v4182_v0  ;;  %2877 = vmatprep.subr.bf16.mxu1 %v4182_v0 }
 0x2ff   :  { %2858 = vmatpush3.bf16.msra.mxu0 %v3661_v11  ;;  %2878 = vmatpush3.bf16.msra.mxu1 %v3661_v11 }
 0x300   :  { %2859 = vmatprep.subr.bf16.mxu0 %v4182_v0  ;;  %2879 = vmatprep.subr.bf16.mxu1 %v4182_v0 }
 0x308   :  { %v3572_v7 = vpop.f32.mrf.mxu0  ;;  %v3574_v8 = vpop.f32.mrf.mxu1 }
 0x309   :  { %v1445_v12 = vsel %vm1421_vm3, %v3572_v7, 0.0  ;;  %v1467_v13 = vmul.f32 %v3572_v7, %v3572_v7  ;;  %v1469_v20 = vmul.f32 %v3574_v8, %v3574_v8  ;;  %v1449_v28 = vsel %vm1421_vm3, %v3574_v8, 0.0 }
 0x30a   :  { %v1446_v17 = vadd.f32 %v1445_v12, %v1444_v6  ;;  %v3581_v38 = vpop.f32.mrf.mxu0  ;;  %v3583_v18 = vpop.f32.mrf.mxu1 }
 0x30b   :  { %v1494_v19 = vsel %vm1421_vm3, %v1467_v13, 0.0  ;;  %v1447_v21 = vsel %vm1421_vm3, %v3581_v38, 0.0  ;;  %v1468_v22 = vmul.f32 %v3581_v38, %v3581_v38  ;;  %v1470_v33 = vmul.f32 %v3583_v18, %v3583_v18  ;;  %v3665_v13 = vld [vmem:[#allocation6 + $0x8] sm:$0xff] }
 0x30c   :  { %v1495_v23 = vadd.f32 %v1494_v19, %v1493_v14  ;;  %v1377_v24 = vpop.f32.mrf.mxu0  ;;  %v1418_v25 = vpop.f32.mrf.mxu1  ;;  %v1448_v26 = vadd.f32 %v1447_v21, %v1446_v17  ;;  %v1451_v34 = vsel %vm1421_vm3, %v3583_v18, 0.0  ;;  %v1498_v35 = vsel %vm1421_vm3, %v1469_v20, 0.0  ;;  %v3669_v14 = vld [vmem:[#allocation7 + $0x8] sm:$0xff]  ;;  %v3675_v19 = vld [vmem:[#allocation9] sm:$0xff]  }
 0x30d   :  { %v1496_v27 = vsel %vm1421_vm3, %v1468_v22, 0.0  ;;  %v1500_v39 = vsel %vm1421_vm3, %v1470_v33, 0.0  ;;  %2860 = vmatpush3.bf16.msra.mxu0 %v3675_v19  ;;  %2880 = vmatpush3.bf16.msra.mxu1 %v3675_v19 }
 0x30e   :  { %v1378_v29 = vpop.f32.mrf.mxu0  ;;  %v1419_v30 = vpop.f32.mrf.mxu1  ;;  %v1450_v31 = vadd.f32 %v1449_v28, %v1448_v26  ;;  %v1497_v32 = vadd.f32 %v1496_v27, %v1495_v23  ;;  %2885 = vmatprep.subr.bf16.mxu0 %v4182_v0  ;;  %2905 = vmatprep.subr.bf16.mxu1 %v4182_v0 }
 0x310   :  { %v1452_v36 = vadd.f32 %v1451_v34, %v1450_v31  ;;  %v1499_v37 = vadd.f32 %v1498_v35, %v1497_v32  ;;  %v3701_v34 = vsub.s32 0, %v1547_v51  ;;  %v3703_v35 = vsub.s32 1, %v1547_v51 }
 0x312   :  { %1453 = vadd.xlane.f32.xlu0 %v1452_v36  ;;  %v1501_v40 = vadd.f32 %v1500_v39, %v1499_v37  ;;  %v3705_v36 = vsub.s32 2, %v1547_v51  ;;  %v3707_v37 = vsub.s32 3, %v1547_v51  ;;  %v1549_v39 = vrot.slane %v3625_v53, %v3701_v34 }
 0x313   :  { %v1649_v44 = vrot.slane %v3631_v58, %v3701_v34  ;;  %v1681_v51 = vrot.slane %v3669_v14, %v3701_v34 }
 0x314   :  { %v1689_v25 = vrot.slane %v3669_v14, %v3705_v36 }
 0x316   :  { %1502 = vadd.xlane.f32.xlu0 %v1501_v40  ;;  %v1553_v40 = vrot.slane %v3625_v53, %v3703_v35 }
 0x39b   :  { %v1454_v27 = vpop.xlane.xlu0 %1453 }
 0x39c   :  { %v3697_v28 = vmul.f32 0.00048828125, %v1454_v27  ;;  %v1653_v27 = vrot.slane %v3631_v58, %v3703_v35 }
 0x39e   :  { %v1506_v30 = vmul.f32 %v3697_v28, %v3697_v28  ;;  %v1508_v0 = vsub.f32 %v3489_v45, %v3697_v28  ;;  %v1509_v26 = vsub.f32 %v3493_v47, %v3697_v28  ;;  %v1513_v22 = vsub.f32 %v3501_v55, %v3697_v28 }
 0x39f   :  { %v1503_v29 = vpop.xlane.xlu0 %1502  ;;  %v1514_v45 = vsub.f32 %v3499_v49, %v3697_v28  ;;  %v1515_v47 = vsub.f32 %v3503_v56, %v3697_v28  ;;  %v1516_v20 = vsub.f32 %v3519_v9, %v3697_v28  ;;  %v1517_v17 = vsub.f32 %v3528_v15, %v3697_v28 }
 0x3a0   :  { %v1505_v31 = vmul.f32 0.00048828125, %v1503_v29  ;;  %v1581_v29 = vrot.slane %v3665_v13, %v3701_v34  ;;  %v1693_v34 = vrot.slane %v3669_v14, %v3707_v37 }
 0x3a2   :  { %v1507_v32 = vsub.f32 %v1505_v31, %v1506_v30  ;;  %v1585_v30 = vrot.slane %v3665_v13, %v3703_v35  ;;  %v1685_v31 = vrot.slane %v3669_v14, %v3703_v35  ;;  %v1512_v35 = vsub.f32 %v3497_v54, %v3697_v28 }
 0x3a4   :  { %v1524_v33 = vadd.f32 1e-05, %v1507_v32  ;;  %v1589_v32 = vrot.slane %v3665_v13, %v3705_v36 }
 0x3a6   :  { %3205 = vrsqrt.f32 %v1524_v33  ;;  %v1593_v33 = vrot.slane %v3665_v13, %v3707_v37 }
 0x3b3   :  { %v3737_v24 = vpop.eup %3205 }
 0x3b4   :  { %v1526_v23 = vmul.f32 %v3737_v24, %v1508_v0  ;;  %v1527_v21 = vmul.f32 %v3737_v24, %v1509_v26  ;;  %v1530_v54 = vmul.f32 %v3737_v24, %v1512_v35  ;;  %v1531_v55 = vmul.f32 %v3737_v24, %v1513_v22 }
 0x3b5   :  { %v1532_v12 = vmul.f32 %v3737_v24, %v1514_v45  ;;  %v1533_v49 = vmul.f32 %v3737_v24, %v1515_v47  ;;  %v1518_v0 = vsub.f32 %v3521_v10, %v3697_v28  ;;  %v1519_v26 = vsub.f32 %v3530_v16, %v3697_v28 }
 0x3b6   :  { %v1626_v6 = vmul.f32 %v1549_v39, %v1526_v23  ;;  %v1627_v56 = vmul.f32 %v1553_v40, %v1527_v21  ;;  %v1630_v9 = vmul.f32 %v1565_v60, %v1530_v54  ;;  %v1631_v15 = vmul.f32 %v1569_v63, %v1531_v55 }
 0x3b7   :  { %v1632_v22 = vmul.f32 %v1573_v3, %v1532_v12  ;;  %v1633_v21 = vmul.f32 %v1577_v5, %v1533_v49  ;;  %v1520_v16 = vsub.f32 %v3572_v7, %v3697_v28  ;;  %v1521_v60 = vsub.f32 %v3581_v38, %v3697_v28 }
 0x3b8   :  { %v1726_v10 = vadd.f32 %v1649_v44, %v1626_v6  ;;  %v1727_v23 = vadd.f32 %v1653_v27, %v1627_v56  ;;  %v3780_v63 = vadd.f32 %v1665_v2, %v1630_v9  ;;  %v3785_v3 = vadd.f32 %v1669_v4, %v1631_v15 }
 0x3b9   :  { %v4184_v5 = vrot.slane %v3631_v58, %v3637_v61  ;;  %v4185_v7 = vrot.slane %v3631_v58, %v3645_v1  ;;  %v1534_v38 = vmul.f32 %v3737_v24, %v1516_v20  ;;  %v1535_v2 = vmul.f32 %v3737_v24, %v1517_v17 }
 0x3ba   :  { %3207 = vtanh.f32 %v1726_v10  ;;  %v1536_v39 = vmul.f32 %v3737_v24, %v1518_v0  ;;  %v1537_v4 = vmul.f32 %v3737_v24, %v1519_v26  ;;  %v1538_v40 = vmul.f32 %v3737_v24, %v1520_v16 }
 0x3bb   :  { %v3790_v6 = vadd.f32 %v4184_v5, %v1632_v22  ;;  %v3795_v12 = vadd.f32 %v4185_v7, %v1633_v21  ;;  %3209 = vtanh.f32 %v1727_v23  ;;  %v1539_v44 = vmul.f32 %v3737_v24, %v1521_v60 }
 0x3bc   :  { %v1634_v27 = vmul.f32 %v1581_v29, %v1534_v38  ;;  %v1635_v35 = vmul.f32 %v1585_v30, %v1535_v2  ;;  %v1636_v45 = vmul.f32 %v1589_v32, %v1536_v39  ;;  %v1637_v47 = vmul.f32 %v1593_v33, %v1537_v4 }
 0x3bd   :  { %v4186_v54 = vrot.slane %v3665_v13, %v3629_v57  ;;  %v4187_v17 = vrot.slane %v3665_v13, %v3633_v59  ;;  %v1522_v49 = vsub.f32 %v3574_v8, %v3697_v28  ;;  %v1523_v29 = vsub.f32 %v3583_v18, %v3697_v28 }
 0x3be   :  { %v3811_v56 = vadd.f32 %v1681_v51, %v1634_v27  ;;  %v3813_v0 = vadd.f32 %v1685_v31, %v1635_v35  ;;  %v3815_v26 = vadd.f32 %v1689_v25, %v1636_v45  ;;  %v3819_v30 = vadd.f32 %v1693_v34, %v1637_v47 }
 0x3bf   :  { %v1638_v55 = vmul.f32 %v4186_v54, %v1538_v40  ;;  %v1639_v20 = vmul.f32 %v4187_v17, %v1539_v44  ;;  %v4188_v32 = vrot.slane %v3669_v14, %v3629_v57  ;;  %v4189_v9 = vrot.slane %v3669_v14, %v3633_v59 }
 0x3c0   :  { %v1540_v51 = vmul.f32 %v3737_v24, %v1522_v49  ;;  %v1541_v25 = vmul.f32 %v3737_v24, %v1523_v29  ;;  %v4190_v31 = vrot.slane %v3665_v13, %v3637_v61  ;;  %v4191_v34 = vrot.slane %v3665_v13, %v3645_v1 }
 0x3c1   :  { %v3824_v33 = vadd.f32 %v4188_v32, %v1638_v55  ;;  %v3829_v8 = vadd.f32 %v4189_v9, %v1639_v20  ;;  %v4192_v57 = vrot.slane %v3669_v14, %v3637_v61  ;;  %v4193_v59 = vrot.slane %v3669_v14, %v3645_v1 }
 0x3c2   :  { %v1640_v18 = vmul.f32 %v4190_v31, %v1540_v51  ;;  %v1641_v15 = vmul.f32 %v4191_v34, %v1541_v25  ;;  %v1510_v5 = vsub.f32 %v3491_v46, %v3697_v28  ;;  %v1511_v61 = vsub.f32 %v3495_v48, %v3697_v28 }
 0x3c3   :  { %v4194_v13 = vmov 0.0   ;;  %v1557_v14 = vrot.slane %v3625_v53, %v3705_v36  ;;  %v1561_v7 = vrot.slane %v3625_v53, %v3707_v37  ;;  %v1657_v28 = vrot.slane %v3631_v58, %v3705_v36 }
 0x3c4   :  { %v3842_v22 = vadd.f32 %v4192_v57, %v1640_v18  ;;  %v3847_v21 = vadd.f32 %v4193_v59, %v1641_v15  ;;  %v1528_v1 = vmul.f32 %v3737_v24, %v1510_v5  ;;  %v1529_v46 = vmul.f32 %v3737_v24, %v1511_v61 }
 0x3c5   :  { %v1661_v24 = vrot.slane %v3631_v58, %v3707_v37 }
 0x3c6   :  { %v1628_v48 = vmul.f32 %v1557_v14, %v1528_v1  ;;  %v1629_v38 = vmul.f32 %v1561_v7, %v1529_v46 }
 0x3c7   :  { %v3208_v10 = vpop.eup %3207 }
 0x3c8   :  { %v3210_v23 = vpop.eup %3209  ;;  %v1758_v16 = vpack.c.bf16 %v3208_v10, %v3208_v10  ;;  %v1728_v53 = vadd.f32 %v1657_v28, %v1628_v48  ;;  %v1729_v2 = vadd.f32 %v1661_v24, %v1629_v38 }
 0x3c9   :  { %v1759_v60 = vpack.c.bf16 %v3210_v23, %v3210_v23 }
 0x3ca   :  { %2862 = vmatmul.mubr.bf16.vlgmr.msra.gmra.mxu0 %v1758_v16  ;;  %3211 = vtanh.f32 %v1728_v53 }
 0x3cb   :  { %2882 = vmatmul.mubr.bf16.vlgmr.msra.gmra.mxu1 %v1759_v60  ;;  %2886 = vmatpush3.bf16.msra.mxu0 %v3601_v41  ;;  %3213 = vtanh.f32 %v1729_v2 }
 0x3cc   :  { %2906 = vmatpush3.bf16.msra.mxu1 %v3601_v41  ;;  %2887 = vmatprep.subr.bf16.mxu0 %v4194_v13  ;;  %3215 = vtanh.f32 %v3780_v63 }
 0x3cd   :  { %2907 = vmatprep.subr.bf16.mxu1 %v4194_v13  ;;  %2901 = vmatprep.mubr.msk.bf16.mxu0 %vm3386_vm0, %v4194_v13  ;;  %3217 = vtanh.f32 %v3785_v3 }
 0x3ce   :  { %2921 = vmatprep.mubr.msk.bf16.mxu1 %vm3386_vm0, %v4194_v13  ;;  %3219 = vtanh.f32 %v3790_v6 }
 0x3cf   :  { %2888 = vmatpush3.bf16.msra.mxu0 %v3605_v42  ;;  %3221 = vtanh.f32 %v3795_v12 }
 0x3d0   :  { %2908 = vmatpush3.bf16.msra.mxu1 %v3605_v42  ;;  %2889 = vmatprep.subr.bf16.mxu0 %v4194_v13  ;;  %3223 = vtanh.f32 %v3811_v56 }
 0x3d1   :  { %2909 = vmatprep.subr.bf16.mxu1 %v4194_v13  ;;  %3225 = vtanh.f32 %v3813_v0 }
 0x3d2   :  { %3227 = vtanh.f32 %v3815_v26 }
 0x3d3   :  { %2890 = vmatpush3.bf16.msra.mxu0 %v3611_v43  ;;  %3229 = vtanh.f32 %v3819_v30 }
 0x3d4   :  { %2910 = vmatpush3.bf16.msra.mxu1 %v3611_v43  ;;  %2891 = vmatprep.subr.bf16.mxu0 %v4194_v13  ;;  %3231 = vtanh.f32 %v3824_v33 }
 0x3d5   :  { %2911 = vmatprep.subr.bf16.mxu1 %v4194_v13  ;;  %3233 = vtanh.f32 %v3829_v8 }
 0x3d7   :  { %2892 = vmatpush3.bf16.msra.mxu0 %v3617_v50  ;;  %v3212_v58 = vpop.eup %3211 }
 0x3d8   :  { %2912 = vmatpush3.bf16.msra.mxu1 %v3617_v50  ;;  %2893 = vmatprep.subr.bf16.mxu0 %v4194_v13  ;;  %v3214_v36 = vpop.eup %3213  ;;  %v1760_v37 = vpack.c.bf16 %v3212_v58, %v3212_v58 }
 0x3d9   :  { %2913 = vmatprep.subr.bf16.mxu1 %v4194_v13  ;;  %v1761_v39 = vpack.c.bf16 %v3214_v36, %v3214_v36  ;;  %v3216_v63 = vpop.eup %3215 }
 0x3da   :  { %v3218_v3 = vpop.eup %3217  ;;  %v1762_v4 = vpack.c.bf16 %v3216_v63, %v3216_v63 }
 0x3db   :  { %2894 = vmatpush3.bf16.msra.mxu0 %v3623_v52  ;;  %v1763_v40 = vpack.c.bf16 %v3218_v3, %v3218_v3  ;;  %v3220_v6 = vpop.eup %3219 }
 0x3dc   :  { %2914 = vmatpush3.bf16.msra.mxu1 %v3623_v52  ;;  %2895 = vmatprep.subr.bf16.mxu0 %v4194_v13  ;;  %v3222_v12 = vpop.eup %3221  ;;  %v1764_v44 = vpack.c.bf16 %v3220_v6, %v3220_v6 }
 0x3dd   :  { %2915 = vmatprep.subr.bf16.mxu1 %v4194_v13  ;;  %v1765_v27 = vpack.c.bf16 %v3222_v12, %v3222_v12  ;;  %v3224_v35 = vpop.eup %3223 }
 0x3de   :  { %v3226_v45 = vpop.eup %3225  ;;  %v1766_v47 = vpack.c.bf16 %v3224_v35, %v3224_v35 }
 0x3df   :  { %2896 = vmatpush3.bf16.msra.mxu0 %v3641_v62  ;;  %v1767_v54 = vpack.c.bf16 %v3226_v45, %v3226_v45  ;;  %v3228_v55 = vpop.eup %3227 }
 0x3e0   :  { %2916 = vmatpush3.bf16.msra.mxu1 %v3641_v62  ;;  %2897 = vmatprep.subr.bf16.mxu0 %v4194_v13  ;;  %v3230_v17 = vpop.eup %3229  ;;  %v1768_v20 = vpack.c.bf16 %v3228_v55, %v3228_v55 }
 0x3e1   :  { %2917 = vmatprep.subr.bf16.mxu1 %v4194_v13  ;;  %v1769_v49 = vpack.c.bf16 %v3230_v17, %v3230_v17  ;;  %v3232_v56 = vpop.eup %3231 }
 0x3e2   :  { %v3234_v0 = vpop.eup %3233  ;;  %v1770_v26 = vpack.c.bf16 %v3232_v56, %v3232_v56 }
 0x3e3   :  { %2898 = vmatpush3.bf16.msra.mxu0 %v3661_v11  ;;  %v1771_v29 = vpack.c.bf16 %v3234_v0, %v3234_v0 }
 0x3e4   :  { %2918 = vmatpush3.bf16.msra.mxu1 %v3661_v11  ;;  %2899 = vmatprep.subr.bf16.mxu0 %v4194_v13 }
 0x3e5   :  { %2919 = vmatprep.subr.bf16.mxu1 %v4194_v13 }
 0x3e7   :  { %2900 = vmatpush3.bf16.msra.mxu0 %v3675_v19 }
 0x3e8   :  { %2920 = vmatpush3.bf16.msra.mxu1 %v3675_v19  ;;  %2925 = vmatprep.subr.bf16.mxu0 %v4194_v13 }
 0x3e9   :  { %2945 = vmatprep.subr.bf16.mxu1 %v4194_v13 }
 0x3ea   :  { %2902 = vmatmul.mubr.bf16.vlgmr.msra.gmra.mxu0 %v1760_v37 }
 0x3eb   :  { %2922 = vmatmul.mubr.bf16.vlgmr.msra.gmra.mxu1 %v1761_v39  ;;  %2926 = vmatpush3.bf16.msra.mxu0 %v3601_v41 }
 0x3ec   :  { %2946 = vmatpush3.bf16.msra.mxu1 %v3601_v41  ;;  %2927 = vmatprep.subr.bf16.mxu0 %v4194_v13 }
 0x3ed   :  { %2947 = vmatprep.subr.bf16.mxu1 %v4194_v13  ;;  %2941 = vmatprep.mubr.msk.bf16.mxu0 %vm3386_vm0, %v4194_v13 }
 0x3ee   :  { %2961 = vmatprep.mubr.msk.bf16.mxu1 %vm3386_vm0, %v4194_v13 }
 0x3ef   :  { %2928 = vmatpush3.bf16.msra.mxu0 %v3605_v42 }
 0x3f0   :  { %2948 = vmatpush3.bf16.msra.mxu1 %v3605_v42  ;;  %2929 = vmatprep.subr.bf16.mxu0 %v4194_v13 }
 0x3f1   :  { %2949 = vmatprep.subr.bf16.mxu1 %v4194_v13 }
 0x3f3   :  { %2930 = vmatpush3.bf16.msra.mxu0 %v3611_v43 }
 0x3f4   :  { %2950 = vmatpush3.bf16.msra.mxu1 %v3611_v43  ;;  %2931 = vmatprep.subr.bf16.mxu0 %v4194_v13 }
 0x3f5   :  { %2951 = vmatprep.subr.bf16.mxu1 %v4194_v13 }
 0x3f7   :  { %2932 = vmatpush3.bf16.msra.mxu0 %v3617_v50 }
 0x3f8   :  { %2952 = vmatpush3.bf16.msra.mxu1 %v3617_v50  ;;  %2933 = vmatprep.subr.bf16.mxu0 %v4194_v13 }
 0x3f9   :  { %2953 = vmatprep.subr.bf16.mxu1 %v4194_v13 }
 0x3fb   :  { %2934 = vmatpush3.bf16.msra.mxu0 %v3623_v52 }
 0x3fc   :  { %2954 = vmatpush3.bf16.msra.mxu1 %v3623_v52  ;;  %2935 = vmatprep.subr.bf16.mxu0 %v4194_v13 }
 0x3fd   :  { %2955 = vmatprep.subr.bf16.mxu1 %v4194_v13 }
 0x3ff   :  { %2936 = vmatpush3.bf16.msra.mxu0 %v3641_v62 }
 0x400   :  { %2956 = vmatpush3.bf16.msra.mxu1 %v3641_v62  ;;  %2937 = vmatprep.subr.bf16.mxu0 %v4194_v13 }
 0x401   :  { %2957 = vmatprep.subr.bf16.mxu1 %v4194_v13 }
 0x403   :  { %2938 = vmatpush3.bf16.msra.mxu0 %v3661_v11 }
 0x404   :  { %2958 = vmatpush3.bf16.msra.mxu1 %v3661_v11  ;;  %2939 = vmatprep.subr.bf16.mxu0 %v4194_v13 }
 0x405   :  { %2959 = vmatprep.subr.bf16.mxu1 %v4194_v13 }
 0x407   :  { %2940 = vmatpush3.bf16.msra.mxu0 %v3675_v19 }
 0x408   :  { %2960 = vmatpush3.bf16.msra.mxu1 %v3675_v19  ;;  %2965 = vmatprep.subr.bf16.mxu0 %v4194_v13 }
 0x409   :  { %2985 = vmatprep.subr.bf16.mxu1 %v4194_v13 }
 0x40a   :  { %2942 = vmatmul.mubr.bf16.vlgmr.msra.gmra.mxu0 %v1762_v4 }
 0x40b   :  { %2962 = vmatmul.mubr.bf16.vlgmr.msra.gmra.mxu1 %v1763_v40  ;;  %2966 = vmatpush3.bf16.msra.mxu0 %v3601_v41 }
 0x40c   :  { %2986 = vmatpush3.bf16.msra.mxu1 %v3601_v41  ;;  %2967 = vmatprep.subr.bf16.mxu0 %v4194_v13 }
 0x40d   :  { %2987 = vmatprep.subr.bf16.mxu1 %v4194_v13  ;;  %2981 = vmatprep.mubr.msk.bf16.mxu0 %vm3386_vm0, %v4194_v13 }
 0x40e   :  { %3001 = vmatprep.mubr.msk.bf16.mxu1 %vm3386_vm0, %v4194_v13 }
 0x40f   :  { %2968 = vmatpush3.bf16.msra.mxu0 %v3605_v42 }
 0x410   :  { %2988 = vmatpush3.bf16.msra.mxu1 %v3605_v42  ;;  %2969 = vmatprep.subr.bf16.mxu0 %v4194_v13 }
 0x411   :  { %2989 = vmatprep.subr.bf16.mxu1 %v4194_v13 }
 0x413   :  { %2970 = vmatpush3.bf16.msra.mxu0 %v3611_v43 }
 0x414   :  { %2990 = vmatpush3.bf16.msra.mxu1 %v3611_v43  ;;  %2971 = vmatprep.subr.bf16.mxu0 %v4194_v13 }
 0x415   :  { %2991 = vmatprep.subr.bf16.mxu1 %v4194_v13 }
 0x417   :  { %2972 = vmatpush3.bf16.msra.mxu0 %v3617_v50 }
 0x418   :  { %2992 = vmatpush3.bf16.msra.mxu1 %v3617_v50  ;;  %2973 = vmatprep.subr.bf16.mxu0 %v4194_v13 }
 0x419   :  { %2993 = vmatprep.subr.bf16.mxu1 %v4194_v13 }
 0x41b   :  { %2974 = vmatpush3.bf16.msra.mxu0 %v3623_v52 }
 0x41c   :  { %2994 = vmatpush3.bf16.msra.mxu1 %v3623_v52  ;;  %2975 = vmatprep.subr.bf16.mxu0 %v4194_v13 }
 0x41d   :  { %2995 = vmatprep.subr.bf16.mxu1 %v4194_v13 }
 0x41f   :  { %2976 = vmatpush3.bf16.msra.mxu0 %v3641_v62 }
 0x420   :  { %2996 = vmatpush3.bf16.msra.mxu1 %v3641_v62  ;;  %2977 = vmatprep.subr.bf16.mxu0 %v4194_v13 }
 0x421   :  { %2997 = vmatprep.subr.bf16.mxu1 %v4194_v13 }
 0x423   :  { %2978 = vmatpush3.bf16.msra.mxu0 %v3661_v11 }
 0x424   :  { %2998 = vmatpush3.bf16.msra.mxu1 %v3661_v11  ;;  %2979 = vmatprep.subr.bf16.mxu0 %v4194_v13 }
 0x425   :  { %2999 = vmatprep.subr.bf16.mxu1 %v4194_v13 }
 0x427   :  { %2980 = vmatpush3.bf16.msra.mxu0 %v3675_v19 }
 0x428   :  { %3000 = vmatpush3.bf16.msra.mxu1 %v3675_v19  ;;  %3005 = vmatprep.subr.bf16.mxu0 %v4194_v13 }
 0x429   :  { %3025 = vmatprep.subr.bf16.mxu1 %v4194_v13 }
 0x42a   :  { %2982 = vmatmul.mubr.bf16.vlgmr.msra.gmra.mxu0 %v1764_v44 }
 0x42b   :  { %3002 = vmatmul.mubr.bf16.vlgmr.msra.gmra.mxu1 %v1765_v27  ;;  %3006 = vmatpush3.bf16.msra.mxu0 %v3601_v41 }
 0x42c   :  { %3026 = vmatpush3.bf16.msra.mxu1 %v3601_v41  ;;  %3007 = vmatprep.subr.bf16.mxu0 %v4194_v13 }
 0x42d   :  { %3027 = vmatprep.subr.bf16.mxu1 %v4194_v13  ;;  %3021 = vmatprep.mubr.msk.bf16.mxu0 %vm3386_vm0, %v4194_v13 }
 0x42e   :  { %3041 = vmatprep.mubr.msk.bf16.mxu1 %vm3386_vm0, %v4194_v13 }
 0x42f   :  { %3008 = vmatpush3.bf16.msra.mxu0 %v3605_v42 }
 0x430   :  { %3028 = vmatpush3.bf16.msra.mxu1 %v3605_v42  ;;  %3009 = vmatprep.subr.bf16.mxu0 %v4194_v13 }
 0x431   :  { %3029 = vmatprep.subr.bf16.mxu1 %v4194_v13 }
 0x433   :  { %3010 = vmatpush3.bf16.msra.mxu0 %v3611_v43 }
 0x434   :  { %3030 = vmatpush3.bf16.msra.mxu1 %v3611_v43  ;;  %3011 = vmatprep.subr.bf16.mxu0 %v4194_v13 }
 0x435   :  { %3031 = vmatprep.subr.bf16.mxu1 %v4194_v13 }
 0x437   :  { %3012 = vmatpush3.bf16.msra.mxu0 %v3617_v50 }
 0x438   :  { %3032 = vmatpush3.bf16.msra.mxu1 %v3617_v50  ;;  %3013 = vmatprep.subr.bf16.mxu0 %v4194_v13 }
 0x439   :  { %3033 = vmatprep.subr.bf16.mxu1 %v4194_v13 }
 0x43b   :  { %3014 = vmatpush3.bf16.msra.mxu0 %v3623_v52 }
 0x43c   :  { %3034 = vmatpush3.bf16.msra.mxu1 %v3623_v52  ;;  %3015 = vmatprep.subr.bf16.mxu0 %v4194_v13 }
 0x43d   :  { %3035 = vmatprep.subr.bf16.mxu1 %v4194_v13 }
 0x43f   :  { %3016 = vmatpush3.bf16.msra.mxu0 %v3641_v62 }
 0x440   :  { %3036 = vmatpush3.bf16.msra.mxu1 %v3641_v62  ;;  %3017 = vmatprep.subr.bf16.mxu0 %v4194_v13 }
 0x441   :  { %3037 = vmatprep.subr.bf16.mxu1 %v4194_v13 }
 0x443   :  { %3018 = vmatpush3.bf16.msra.mxu0 %v3661_v11 }
 0x444   :  { %3038 = vmatpush3.bf16.msra.mxu1 %v3661_v11  ;;  %3019 = vmatprep.subr.bf16.mxu0 %v4194_v13 }
 0x445   :  { %3039 = vmatprep.subr.bf16.mxu1 %v4194_v13 }
 0x447   :  { %3020 = vmatpush3.bf16.msra.mxu0 %v3675_v19 }
 0x448   :  { %3040 = vmatpush3.bf16.msra.mxu1 %v3675_v19  ;;  %3045 = vmatprep.subr.bf16.mxu0 %v4194_v13 }
 0x449   :  { %3065 = vmatprep.subr.bf16.mxu1 %v4194_v13 }
 0x44a   :  { %3022 = vmatmul.mubr.bf16.vlgmr.msra.gmra.mxu0 %v1766_v47 }
 0x44b   :  { %3042 = vmatmul.mubr.bf16.vlgmr.msra.gmra.mxu1 %v1767_v54  ;;  %3046 = vmatpush3.bf16.msra.mxu0 %v3601_v41 }
 0x44c   :  { %3066 = vmatpush3.bf16.msra.mxu1 %v3601_v41  ;;  %3047 = vmatprep.subr.bf16.mxu0 %v4194_v13 }
 0x44d   :  { %3067 = vmatprep.subr.bf16.mxu1 %v4194_v13  ;;  %3061 = vmatprep.mubr.msk.bf16.mxu0 %vm3386_vm0, %v4194_v13 }
 0x44e   :  { %3081 = vmatprep.mubr.msk.bf16.mxu1 %vm3386_vm0, %v4194_v13 }
 0x44f   :  { %3048 = vmatpush3.bf16.msra.mxu0 %v3605_v42 }
 0x450   :  { %3068 = vmatpush3.bf16.msra.mxu1 %v3605_v42  ;;  %3049 = vmatprep.subr.bf16.mxu0 %v4194_v13 }
 0x451   :  { %3069 = vmatprep.subr.bf16.mxu1 %v4194_v13 }
 0x453   :  { %3050 = vmatpush3.bf16.msra.mxu0 %v3611_v43 }
 0x454   :  { %3070 = vmatpush3.bf16.msra.mxu1 %v3611_v43  ;;  %3051 = vmatprep.subr.bf16.mxu0 %v4194_v13 }
 0x455   :  { %3071 = vmatprep.subr.bf16.mxu1 %v4194_v13 }
 0x457   :  { %3052 = vmatpush3.bf16.msra.mxu0 %v3617_v50 }
 0x458   :  { %3072 = vmatpush3.bf16.msra.mxu1 %v3617_v50  ;;  %3053 = vmatprep.subr.bf16.mxu0 %v4194_v13 }
 0x459   :  { %3073 = vmatprep.subr.bf16.mxu1 %v4194_v13 }
 0x45b   :  { %3054 = vmatpush3.bf16.msra.mxu0 %v3623_v52 }
 0x45c   :  { %3074 = vmatpush3.bf16.msra.mxu1 %v3623_v52  ;;  %3055 = vmatprep.subr.bf16.mxu0 %v4194_v13 }
 0x45d   :  { %3075 = vmatprep.subr.bf16.mxu1 %v4194_v13 }
 0x45f   :  { %3056 = vmatpush3.bf16.msra.mxu0 %v3641_v62 }
 0x460   :  { %3076 = vmatpush3.bf16.msra.mxu1 %v3641_v62  ;;  %3057 = vmatprep.subr.bf16.mxu0 %v4194_v13 }
 0x461   :  { %3077 = vmatprep.subr.bf16.mxu1 %v4194_v13 }
 0x463   :  { %3058 = vmatpush3.bf16.msra.mxu0 %v3661_v11 }
 0x464   :  { %3078 = vmatpush3.bf16.msra.mxu1 %v3661_v11  ;;  %3059 = vmatprep.subr.bf16.mxu0 %v4194_v13 }
 0x465   :  { %3079 = vmatprep.subr.bf16.mxu1 %v4194_v13 }
 0x467   :  { %3060 = vmatpush3.bf16.msra.mxu0 %v3675_v19 }
 0x468   :  { %3080 = vmatpush3.bf16.msra.mxu1 %v3675_v19  ;;  %3085 = vmatprep.subr.bf16.mxu0 %v4194_v13 }
 0x469   :  { %3105 = vmatprep.subr.bf16.mxu1 %v4194_v13 }
 0x46a   :  { %3062 = vmatmul.mubr.bf16.vlgmr.msra.gmra.mxu0 %v1768_v20 }
 0x46b   :  { %3082 = vmatmul.mubr.bf16.vlgmr.msra.gmra.mxu1 %v1769_v49  ;;  %3086 = vmatpush3.bf16.msra.mxu0 %v3601_v41 }
 0x46c   :  { %3106 = vmatpush3.bf16.msra.mxu1 %v3601_v41  ;;  %3087 = vmatprep.subr.bf16.mxu0 %v4194_v13 }
 0x46d   :  { %3107 = vmatprep.subr.bf16.mxu1 %v4194_v13  ;;  %3101 = vmatprep.mubr.msk.bf16.mxu0 %vm3386_vm0, %v4194_v13 }
 0x46e   :  { %3121 = vmatprep.mubr.msk.bf16.mxu1 %vm3386_vm0, %v4194_v13 }
 0x46f   :  { %3088 = vmatpush3.bf16.msra.mxu0 %v3605_v42 }
 0x470   :  { %3108 = vmatpush3.bf16.msra.mxu1 %v3605_v42  ;;  %3089 = vmatprep.subr.bf16.mxu0 %v4194_v13 }
 0x471   :  { %3109 = vmatprep.subr.bf16.mxu1 %v4194_v13 }
 0x473   :  { %3090 = vmatpush3.bf16.msra.mxu0 %v3611_v43 }
 0x474   :  { %3110 = vmatpush3.bf16.msra.mxu1 %v3611_v43  ;;  %3091 = vmatprep.subr.bf16.mxu0 %v4194_v13 }
 0x475   :  { %3111 = vmatprep.subr.bf16.mxu1 %v4194_v13 }
 0x477   :  { %3092 = vmatpush3.bf16.msra.mxu0 %v3617_v50 }
 0x478   :  { %3112 = vmatpush3.bf16.msra.mxu1 %v3617_v50  ;;  %3093 = vmatprep.subr.bf16.mxu0 %v4194_v13 }
 0x479   :  { %3113 = vmatprep.subr.bf16.mxu1 %v4194_v13 }
 0x47b   :  { %3094 = vmatpush3.bf16.msra.mxu0 %v3623_v52 }
 0x47c   :  { %3114 = vmatpush3.bf16.msra.mxu1 %v3623_v52  ;;  %3095 = vmatprep.subr.bf16.mxu0 %v4194_v13 }
 0x47d   :  { %3115 = vmatprep.subr.bf16.mxu1 %v4194_v13 }
 0x47f   :  { %3096 = vmatpush3.bf16.msra.mxu0 %v3641_v62 }
 0x480   :  { %3116 = vmatpush3.bf16.msra.mxu1 %v3641_v62  ;;  %3097 = vmatprep.subr.bf16.mxu0 %v4194_v13 }
 0x481   :  { %3117 = vmatprep.subr.bf16.mxu1 %v4194_v13 }
 0x483   :  { %3098 = vmatpush3.bf16.msra.mxu0 %v3661_v11 }
 0x484   :  { %3118 = vmatpush3.bf16.msra.mxu1 %v3661_v11  ;;  %3099 = vmatprep.subr.bf16.mxu0 %v4194_v13 }
 0x485   :  { %3119 = vmatprep.subr.bf16.mxu1 %v4194_v13 }
 0x487   :  { %3100 = vmatpush3.bf16.msra.mxu0 %v3675_v19 }
 0x488   :  { %3120 = vmatpush3.bf16.msra.mxu1 %v3675_v19  ;;  %3125 = vmatprep.subr.bf16.mxu0 %v4194_v13 }
 0x489   :  { %3145 = vmatprep.subr.bf16.mxu1 %v4194_v13 }
 0x48a   :  { %3102 = vmatmul.mubr.bf16.vlgmr.msra.gmra.mxu0 %v1770_v26  ;;  %v1872_v30 = vpop.f32.mrf.mxu0 }
 0x48b   :  { %3122 = vmatmul.mubr.bf16.vlgmr.msra.gmra.mxu1 %v1771_v29  ;;  %3235 = vtanh.f32 %v1872_v30  ;;  %v1914_v32 = vpop.f32.mrf.mxu1  ;;  %3126 = vmatpush3.bf16.msra.mxu0 %v3601_v41 }
 0x48c   :  { %3237 = vtanh.f32 %v1914_v32  ;;  %3146 = vmatpush3.bf16.msra.mxu1 %v3601_v41  ;;  %v2863_v33 = vpop.f32.mrf.mxu0  ;;  %3127 = vmatprep.subr.bf16.mxu0 %v4194_v13 }
 0x48d   :  { %v2883_v9 = vpop.f32.mrf.mxu1  ;;  %3147 = vmatprep.subr.bf16.mxu1 %v4194_v13  ;;  %3141 = vmatprep.mubr.msk.bf16.mxu0 %vm3386_vm0, %v4194_v13  ;;  %3239 = vtanh.f32 %v3842_v22 }
 0x48e   :  { %v1875_v8 = vpop.f32.mrf.mxu0  ;;  %3161 = vmatprep.mubr.msk.bf16.mxu1 %vm3386_vm0, %v4194_v13  ;;  %3241 = vtanh.f32 %v3847_v21 }
 0x48f   :  { %v1917_v51 = vpop.f32.mrf.mxu1  ;;  %3128 = vmatpush3.bf16.msra.mxu0 %v3605_v42 }
 0x490   :  { %3148 = vmatpush3.bf16.msra.mxu1 %v3605_v42  ;;  %v2864_v25 = vpop.f32.mrf.mxu0  ;;  %3129 = vmatprep.subr.bf16.mxu0 %v4194_v13 }
 0x491   :  { %v2884_v41 = vpop.f32.mrf.mxu1  ;;  %3149 = vmatprep.subr.bf16.mxu1 %v4194_v13 }
 0x493   :  { %3130 = vmatpush3.bf16.msra.mxu0 %v3611_v43 }
 0x494   :  { %3150 = vmatpush3.bf16.msra.mxu1 %v3611_v43  ;;  %3131 = vmatprep.subr.bf16.mxu0 %v4194_v13 }
 0x495   :  { %3151 = vmatprep.subr.bf16.mxu1 %v4194_v13 }
 0x497   :  { %3132 = vmatpush3.bf16.msra.mxu0 %v3617_v50 }
 0x498   :  { %v3236_v31 = vpop.eup %3235  ;;  %3152 = vmatpush3.bf16.msra.mxu1 %v3617_v50  ;;  %3133 = vmatprep.subr.bf16.mxu0 %v4194_v13 }
 0x499   :  { %v3238_v42 = vpop.eup %3237  ;;  %1879 = vst [vmem:[%s4181_s8] sm:$0x3] %v3236_v31  ;;  %3153 = vmatprep.subr.bf16.mxu1 %v4194_v13 }
 0x49a   :  { %1921 = vst [vmem:[%s4181_s8 + $0x2] sm:$0x3] %v3238_v42  ;;  %v3240_v43 = vpop.eup %3239 }
 0x49b   :  { %3134 = vmatpush3.bf16.msra.mxu0 %v3623_v52  ;;  %v3242_v50 = vpop.eup %3241 }
 0x49c   :  { %3154 = vmatpush3.bf16.msra.mxu1 %v3623_v52  ;;  %3135 = vmatprep.subr.bf16.mxu0 %v4194_v13  ;;  %v1772_v52 = vpack.c.bf16 %v3240_v43, %v3240_v43 }
 0x49d   :  { %3155 = vmatprep.subr.bf16.mxu1 %v4194_v13 }
 0x49f   :  { %3136 = vmatpush3.bf16.msra.mxu0 %v3641_v62 }
 0x4a0   :  { %3156 = vmatpush3.bf16.msra.mxu1 %v3641_v62  ;;  %3137 = vmatprep.subr.bf16.mxu0 %v4194_v13  ;;  %v1773_v62 = vpack.c.bf16 %v3242_v50, %v3242_v50 }
 0x4a1   :  { %3157 = vmatprep.subr.bf16.mxu1 %v4194_v13 }
 0x4a3   :  { %3138 = vmatpush3.bf16.msra.mxu0 %v3661_v11 }
 0x4a4   :  { %3158 = vmatpush3.bf16.msra.mxu1 %v3661_v11  ;;  %3139 = vmatprep.subr.bf16.mxu0 %v4194_v13 }
 0x4a5   :  { %3159 = vmatprep.subr.bf16.mxu1 %v4194_v13 }
 0x4a7   :  { %3140 = vmatpush3.bf16.msra.mxu0 %v3675_v19 }
 0x4a8   :  { %3160 = vmatpush3.bf16.msra.mxu1 %v3675_v19 }
 0x4aa   :  { %v1956_v18 = vpop.f32.mrf.mxu0  ;;  %3142 = vmatmul.mubr.bf16.vlgmr.msra.gmra.mxu0 %v1772_v52 }
 0x4ab   :  { %3243 = vtanh.f32 %v1956_v18  ;;  %v1998_v34 = vpop.f32.mrf.mxu1  ;;  %3162 = vmatmul.mubr.bf16.vlgmr.msra.gmra.mxu1 %v1773_v62 }
 0x4ac   :  { %3245 = vtanh.f32 %v1998_v34  ;;  %v2903_v15 = vpop.f32.mrf.mxu0 }
 0x4ad   :  { %v2923_v11 = vpop.f32.mrf.mxu1 }
 0x4ae   :  { %v1959_v57 = vpop.f32.mrf.mxu0 }
 0x4af   :  { %v2001_v22 = vpop.f32.mrf.mxu1 }
 0x4b0   :  { %v2904_v59 = vpop.f32.mrf.mxu0 }
 0x4b1   :  { %v2924_v21 = vpop.f32.mrf.mxu1 }
 0x4b8   :  { %v3244_v10 = vpop.eup %3243 }
 0x4b9   :  { %v3246_v23 = vpop.eup %3245  ;;  %1963 = vst [vmem:[%s4181_s8 + $0x4] sm:$0x3] %v3244_v10 }
 0x4ba   :  { %2005 = vst [vmem:[%s4181_s8 + $0x6] sm:$0x3] %v3246_v23 }
 0x4ca   :  { %v2040_v19 = vpop.f32.mrf.mxu0 }
 0x4cb   :  { %3247 = vtanh.f32 %v2040_v19  ;;  %v2082_v16 = vpop.f32.mrf.mxu1 }
 0x4cc   :  { %3249 = vtanh.f32 %v2082_v16  ;;  %v2943_v60 = vpop.f32.mrf.mxu0 }
 0x4cd   :  { %v2963_v5 = vpop.f32.mrf.mxu1 }
 0x4ce   :  { %v2043_v61 = vpop.f32.mrf.mxu0 }
 0x4cf   :  { %v2085_v13 = vpop.f32.mrf.mxu1 }
 0x4d0   :  { %v2944_v1 = vpop.f32.mrf.mxu0 }
 0x4d1   :  { %v2964_v14 = vpop.f32.mrf.mxu1 }
 0x4d8   :  { %v3248_v46 = vpop.eup %3247 }
 0x4d9   :  { %v3250_v7 = vpop.eup %3249  ;;  %2047 = vst [vmem:[%s4181_s8 + $0x8] sm:$0x3] %v3248_v46 }
 0x4da   :  { %2089 = vst [vmem:[%s4181_s8 + $0xa] sm:$0x3] %v3250_v7 }
 0x4ea   :  { %v2124_v48 = vpop.f32.mrf.mxu0 }
 0x4eb   :  { %3251 = vtanh.f32 %v2124_v48  ;;  %v2166_v28 = vpop.f32.mrf.mxu1 }
 0x4ec   :  { %3253 = vtanh.f32 %v2166_v28  ;;  %v2983_v38 = vpop.f32.mrf.mxu0 }
 0x4ed   :  { %v3003_v24 = vpop.f32.mrf.mxu1 }
 0x4ee   :  { %v2127_v53 = vpop.f32.mrf.mxu0 }
 0x4ef   :  { %v2169_v2 = vpop.f32.mrf.mxu1 }
 0x4f0   :  { %v2984_v58 = vpop.f32.mrf.mxu0 }
 0x4f1   :  { %v3004_v36 = vpop.f32.mrf.mxu1 }
 0x4f8   :  { %v3252_v37 = vpop.eup %3251 }
 0x4f9   :  { %v3254_v39 = vpop.eup %3253  ;;  %2131 = vst [vmem:[%s4181_s8 + $0xc] sm:$0x3] %v3252_v37 }
 0x4fa   :  { %2173 = vst [vmem:[%s4181_s8 + $0xe] sm:$0x3] %v3254_v39 }
 0x50a   :  { %v2208_v63 = vpop.f32.mrf.mxu0 }
 0x50b   :  { %3255 = vtanh.f32 %v2208_v63  ;;  %v2250_v3 = vpop.f32.mrf.mxu1 }
 0x50c   :  { %3257 = vtanh.f32 %v2250_v3  ;;  %v3023_v4 = vpop.f32.mrf.mxu0 }
 0x50d   :  { %v3043_v40 = vpop.f32.mrf.mxu1 }
 0x50e   :  { %v2211_v6 = vpop.f32.mrf.mxu0 }
 0x50f   :  { %v2253_v12 = vpop.f32.mrf.mxu1 }
 0x510   :  { %v3024_v44 = vpop.f32.mrf.mxu0 }
 0x511   :  { %v3044_v27 = vpop.f32.mrf.mxu1 }
 0x518   :  { %v3256_v35 = vpop.eup %3255 }
 0x519   :  { %v3258_v45 = vpop.eup %3257  ;;  %2215 = vst [vmem:[%s4181_s8 + $0x10] sm:$0x3] %v3256_v35 }
 0x51a   :  { %2257 = vst [vmem:[%s4181_s8 + $0x12] sm:$0x3] %v3258_v45 }
 0x52a   :  { %v2292_v47 = vpop.f32.mrf.mxu0 }
 0x52b   :  { %3259 = vtanh.f32 %v2292_v47  ;;  %v2334_v54 = vpop.f32.mrf.mxu1 }
 0x52c   :  { %3261 = vtanh.f32 %v2334_v54  ;;  %v3063_v55 = vpop.f32.mrf.mxu0 }
 0x52d   :  { %v3083_v17 = vpop.f32.mrf.mxu1 }
 0x52e   :  { %v2295_v20 = vpop.f32.mrf.mxu0 }
 0x52f   :  { %v2337_v49 = vpop.f32.mrf.mxu1 }
 0x530   :  { %v3064_v56 = vpop.f32.mrf.mxu0 }
 0x531   :  { %v3084_v0 = vpop.f32.mrf.mxu1 }
 0x538   :  { %v3260_v26 = vpop.eup %3259 }
 0x539   :  { %v3262_v29 = vpop.eup %3261  ;;  %2299 = vst [vmem:[%s4181_s8 + $0x14] sm:$0x3] %v3260_v26 }
 0x53a   :  { %2341 = vst [vmem:[%s4181_s8 + $0x16] sm:$0x3] %v3262_v29 }
 0x54a   :  { %v2376_v30 = vpop.f32.mrf.mxu0 }
 0x54b   :  { %3263 = vtanh.f32 %v2376_v30  ;;  %v2418_v32 = vpop.f32.mrf.mxu1 }
 0x54c   :  { %3265 = vtanh.f32 %v2418_v32  ;;  %v3103_v33 = vpop.f32.mrf.mxu0 }
 0x54d   :  { %v3123_v9 = vpop.f32.mrf.mxu1 }
 0x54e   :  { %v2379_v8 = vpop.f32.mrf.mxu0 }
 0x54f   :  { %v2421_v51 = vpop.f32.mrf.mxu1 }
 0x550   :  { %v3104_v25 = vpop.f32.mrf.mxu0 }
 0x551   :  { %v3124_v41 = vpop.f32.mrf.mxu1 }
 0x558   :  { %v3264_v31 = vpop.eup %3263 }
 0x559   :  { %v3266_v42 = vpop.eup %3265  ;;  %2383 = vst [vmem:[%s4181_s8 + $0x18] sm:$0x3] %v3264_v31 }
 0x55a   :  { %2425 = vst [vmem:[%s4181_s8 + $0x1a] sm:$0x3] %v3266_v42 }
 0x56a   :  { %v2460_v43 = vpop.f32.mrf.mxu0 }
 0x56b   :  { %3267 = vtanh.f32 %v2460_v43  ;;  %v2502_v50 = vpop.f32.mrf.mxu1 }
 0x56c   :  { %3269 = vtanh.f32 %v2502_v50  ;;  %v3143_v52 = vpop.f32.mrf.mxu0 }
 0x56d   :  { %v3163_v62 = vpop.f32.mrf.mxu1 }
 0x56e   :  { %v2463_v18 = vpop.f32.mrf.mxu0 }
 0x56f   :  { %v2505_v34 = vpop.f32.mrf.mxu1 }
 0x570   :  { %v3144_v15 = vpop.f32.mrf.mxu0 }
 0x571   :  { %v3164_v11 = vpop.f32.mrf.mxu1 }
 0x578   :  { %v3268_v57 = vpop.eup %3267 }
 0x579   :  { %v3270_v22 = vpop.eup %3269  ;;  %2467 = vst [vmem:[%s4181_s8 + $0x1c] sm:$0x3] %v3268_v57 }
 0x57a   :  { %2509 = vst [vmem:[%s4181_s8 + $0x1e] sm:$0x3] %v3270_v22 }
 0x57b   :  { %2514 = vsyncpa [#allocation3], 1 }
 0x57c   :  { %2515 = vsyncpa [#allocation5], 1 }
 0x57d   :  { %2516 = vsyncpa [#allocation8], 1 }

</bundles_post_ra>
